<compile_context>
chip_gen: v7x
topology: tpu7x:2x2x1
jax: 0.10.0
libtpu: 0.0.40
codegen_flags: <defaults>
</compile_context>

<pallas_src>
import math
import numpy as np
import jax
import jax.numpy as jnp
from jax import lax
from jax.experimental import pallas as pl
from jax.experimental.pallas import tpu as pltpu

# ---------------- configuration (small, consistent with the module) ----------------
EMB = 32          # emb_size
MAX_LEN = 8       # max_len == sequence length L
N_BLOCKS = 2      # n_blocks
N_HEADS = 2       # n_heads
HEAD_DIM = EMB // N_HEADS
N_EXPS = 8        # MoE experts
ITEM_NUM = 50     # data.item_num
BATCH = 2
LN_EPS = 1e-8     # matches torch.nn.LayerNorm(eps=1e-08)

N_TOK = BATCH * MAX_LEN

assert MAX_LEN & (MAX_LEN - 1) == 0, "in-kernel bias uses shift/and; MAX_LEN must be pow2"
LOG2_LEN = MAX_LEN.bit_length() - 1


def _rpad8(n):
    return ((n + 7) // 8) * 8


# ---------------- packed "narrow" (32-lane) slab row layout ----------------
ITEM_ROWS = _rpad8(ITEM_NUM + 2)          # 56 (rows 52..55 are zero pad)
POS_ROWS = _rpad8(MAX_LEN + 2)            # 16
ITEM_OFF = 0
POS_OFF = ITEM_OFF + ITEM_ROWS            # 56
WGATE_OFF = POS_OFF + POS_ROWS            # 72
LNF_OFF = WGATE_OFF + EMB                 # 104
BLK0_OFF = _rpad8(LNF_OFF + 2)            # 112
# per-block row offsets
R_LN1G, R_LN1B, R_LN2G, R_LN2B, R_BOUT, R_BC1, R_BC2 = 0, 1, 2, 3, 4, 5, 6
R_WOUT = 8
R_WC1 = R_WOUT + EMB                      # 40
R_WC2 = R_WC1 + EMB                       # 72
BLK_STRIDE = R_WC2 + EMB                  # 104
S32_ROWS = BLK0_OFF + N_BLOCKS * BLK_STRIDE   # 320

# ---------------- packed MoE (256-lane) slab row layout ----------------
EW_OFF = 0                                # expert weights, sqrt(EMB) folded in
ECORR_OFF = EMB                           # 32 : bias correction row, sqrt(EMB) folded in
B1_OFF = _rpad8(ECORR_OFF + 1)            # 40 : kron(I_E, ones(1,D))
B2_OFF = B1_OFF + N_EXPS                  # 48 : B2^T = kron(ones(1,E), I_D)
MOE_ROWS = B2_OFF + EMB                   # 80

# ---------------- fused-QKV slab ----------------
QKV_ROWS = _rpad8(EMB + 1)                # 40 : rows 0..D-1 = W_qkv [D,3D], row D = bias


def _layernorm(v, g, b):
    mu = jnp.mean(v, axis=-1, keepdims=True)
    var = jnp.mean((v - mu) ** 2, axis=-1, keepdims=True)
    return (v - mu) * lax.rsqrt(var + LN_EPS) * g + b


# ---------------- the single fused kernel ----------------
def unisrec_kernel(idx_ref, s32_ref, moe_ref, qkv_ref, o_ref, stack_ref):
    f32 = jnp.float32
    N, D = N_TOK, EMB

    idx = idx_ref[...]                                   # [N, 2] int32
    seq = idx[:, 0:1]
    pos = idx[:, 1:2]

    # ---- in-kernel embedding gathers: one-hot @ table (MXU; no XLA gather) ----
    item_tab = s32_ref[ITEM_OFF:ITEM_OFF + ITEM_ROWS, :]            # [56, 32]
    pos_tab = s32_ref[POS_OFF:POS_OFF + POS_ROWS, :]                # [16, 32]
    item_oh = (lax.broadcasted_iota(jnp.int32, (N, ITEM_ROWS), 1) == seq).astype(f32)
    pos_oh = (lax.broadcasted_iota(jnp.int32, (N, POS_ROWS), 1) == pos).astype(f32)
    x = jnp.dot(item_oh, item_tab, preferred_element_type=f32)      # [N, D]
    pe = jnp.dot(pos_oh, pos_tab, preferred_element_type=f32)       # [N, D]

    mask = (seq != 0).astype(f32)                                   # [N, 1] timeline mask

    # ---- in-kernel block-diagonal + causal additive bias (iota, no HBM bias) ----
    ri = lax.broadcasted_iota(jnp.int32, (N, N), 0)
    ci = lax.broadcasted_iota(jnp.int32, (N, N), 1)
    same_b = (ri >> LOG2_LEN) == (ci >> LOG2_LEN)
    causal = (ci & (MAX_LEN - 1)) <= (ri & (MAX_LEN - 1))
    attn_bias = jnp.where(jnp.logical_and(same_b, causal), 0.0, -1e30).astype(f32)

    # ---- MoE adaptor (eval: plain softmax gating, no noise) ----
    w_gate = s32_ref[WGATE_OFF:WGATE_OFF + D, 0:N_EXPS]             # [D, E]
    logits = jnp.dot(x, w_gate, preferred_element_type=f32)         # [N, E]
    le = jnp.exp(logits - jnp.max(logits, axis=-1, keepdims=True))
    gates = le * pl.reciprocal(jnp.sum(le, axis=-1, keepdims=True), approx=True)

    ew = moe_ref[EW_OFF:EW_OFF + D, :]                   # [D, E*D], sqrt(D) pre-folded
    ecorr = moe_ref[ECORR_OFF:ECORR_OFF + 1, :]          # [1, E*D], sqrt(D) pre-folded
    b1 = moe_ref[B1_OFF:B1_OFF + N_EXPS, :]              # [E, E*D]
    b2t = moe_ref[B2_OFF:B2_OFF + D, :]                  # [D, E*D]

    dn_t = (((1,), (1,)), ((), ()))                      # contract last dims (no transpose)
    y_all = jnp.dot(x, ew, preferred_element_type=f32) - ecorr      # [N, E*D]
    gexp = jnp.dot(gates, b1, preferred_element_type=f32)           # [N, E*D]
    h = lax.dot_general(gexp * y_all, b2t, dn_t, preferred_element_type=f32)  # [N, D]

    h = (h + pe) * mask                                  # scale already folded into ew/ecorr

    scale = 1.0 / math.sqrt(HEAD_DIM)

    # ---- transformer blocks (static unroll) ----
    for blk in range(N_BLOCKS):
        base = BLK0_OFF + blk * BLK_STRIDE
        ln1_g = s32_ref[base + R_LN1G:base + R_LN1G + 1, :]
        ln1_b = s32_ref[base + R_LN1B:base + R_LN1B + 1, :]
        ln2_g = s32_ref[base + R_LN2G:base + R_LN2G + 1, :]
        ln2_b = s32_ref[base + R_LN2B:base + R_LN2B + 1, :]
        bout = s32_ref[base + R_BOUT:base + R_BOUT + 1, :]
        bc1 = s32_ref[base + R_BC1:base + R_BC1 + 1, :]
        bc2 = s32_ref[base + R_BC2:base + R_BC2 + 1, :]
        wout = s32_ref[base + R_WOUT:base + R_WOUT + D, :]          # [D, D] (in, out)
        wc1 = s32_ref[base + R_WC1:base + R_WC1 + D, :]
        wc2 = s32_ref[base + R_WC2:base + R_WC2 + D, :]
        qkv_blk = qkv_ref[blk]                                      # [40, 3D]
        wqkv = qkv_blk[0:D, :]                                      # [D, 3D] = [Wq|Wk|Wv]
        bqkv = qkv_blk[D:D + 1, :]                                  # [1, 3D]

        hn = _layernorm(h, ln1_g, ln1_b)

        # fused Q|K|V: ONE MXU push on the sublane-stacked [hn; h]
        stack_ref[0:N, :] = hn
        stack_ref[N:2 * N, :] = h
        qkv = jnp.dot(stack_ref[...], wqkv, preferred_element_type=f32) + bqkv  # [2N, 3D]
        q = qkv[0:N, 0:D]             # query from normalized emb (torch order)
        k = qkv[N:2 * N, D:2 * D]     # key from raw (masked) emb
        v = qkv[N:2 * N, 2 * D:3 * D]  # value from raw (masked) emb

        # per-head attention; head concat folded into the output projection
        attn = bout
        for hh in range(N_HEADS):
            sl = slice(hh * HEAD_DIM, (hh + 1) * HEAD_DIM)
            s = lax.dot_general(q[:, sl], k[:, sl], dn_t,
                                preferred_element_type=f32) * scale
            s = s + attn_bias
            p = jnp.exp(s - jnp.max(s, axis=-1, keepdims=True))
            p = p * pl.reciprocal(jnp.sum(p, axis=-1, keepdims=True), approx=True)
            ctx = jnp.dot(p, v[:, sl], preferred_element_type=f32)           # [N, HD]
            attn = attn + jnp.dot(ctx, wout[sl, :], preferred_element_type=f32)

        h1 = hn + attn                # residual with the *normalized* query input
        h2 = _layernorm(h1, ln2_g, ln2_b)

        # PointWiseFeedForward: 1x1 conv -> gelu -> 1x1 conv -> + residual, then mask
        y = jnp.dot(h2, wc1, preferred_element_type=f32) + bc1
        y = jax.nn.gelu(y, approximate=True)   # TODO(synk): torch GELU is exact erf
        y = jnp.dot(y, wc2, preferred_element_type=f32) + bc2
        h = (y + h2) * mask

    lnf_g = s32_ref[LNF_OFF:LNF_OFF + 1, :]
    lnf_b = s32_ref[LNF_OFF + 1:LNF_OFF + 2, :]
    o_ref[...] = _layernorm(h, lnf_g, lnf_b)


# ---------------- pallas_call wrapper ----------------
def _full_spec(shape):
    zeros = (0,) * len(shape)
    return pl.BlockSpec(tuple(shape), lambda i, _z=zeros: _z)


def unisrec_fused_call(idx, kp):
    args = (idx, kp["s32"], kp["moe"], kp["qkv"])
    # Single grid step (everything < 200 KB fits VMEM on v5e/v6e/v7x).
    # NOTE(v7x / large batch): add a leading "parallel" grid axis over per-batch row
    # tiles and (optionally) a bf16 operand cast for the matmuls.
    return pl.pallas_call(
        unisrec_kernel,
        out_shape=jax.ShapeDtypeStruct((N_TOK, EMB), jnp.float32),
        grid=(1,),
        in_specs=[_full_spec(a.shape) for a in args],
        out_specs=_full_spec((N_TOK, EMB)),
        scratch_shapes=[pltpu.VMEM((2 * N_TOK, EMB), jnp.float32)],
        compiler_params=pltpu.CompilerParams(dimension_semantics=("arbitrary",)),
    )(*args)


@jax.jit
def unisrec_forward(seq, pos, kp):
    B, L = seq.shape
    idx = jnp.stack([seq.reshape(-1).astype(jnp.int32),
                     pos.reshape(-1).astype(jnp.int32)], axis=1)     # [N, 2]
    out = unisrec_fused_call(idx, kp)
    return out.reshape(B, L, EMB)


# ---------------- parameter construction (deterministic, torch-layout) ----------------
def make_params(key):
    ks = iter(jax.random.split(key, 64))
    xavier = jax.nn.initializers.xavier_uniform()
    f32 = jnp.float32
    params = {
        "item_emb": xavier(next(ks), (ITEM_NUM + 2, EMB), f32),
        "pos_emb": xavier(next(ks), (MAX_LEN + 2, EMB), f32),
        "w_gate": 0.02 * jax.random.normal(next(ks), (EMB, N_EXPS), f32),
        # torch inits PWLayer bias to zeros; random here so the packed ecorr path is exercised
        "e_bias": 0.02 * jax.random.normal(next(ks), (N_EXPS, EMB), f32),
        "e_w": 0.02 * jax.random.normal(next(ks), (N_EXPS, EMB, EMB), f32),  # [out, in]
        "lnf_g": jnp.ones((EMB,), f32),
        "lnf_b": jnp.zeros((EMB,), f32),
        "blocks": [],
    }
    for _ in range(N_BLOCKS):
        params["blocks"].append(dict(
            ln1_g=jnp.ones((EMB,), f32), ln1_b=jnp.zeros((EMB,), f32),
            in_w=xavier(next(ks), (3 * EMB, EMB), f32),                 # MHA in_proj_weight
            in_b=0.02 * jax.random.normal(next(ks), (3 * EMB,), f32),
            out_w=xavier(next(ks), (EMB, EMB), f32),                    # MHA out_proj
            out_b=0.02 * jax.random.normal(next(ks), (EMB,), f32),
            ln2_g=jnp.ones((EMB,), f32), ln2_b=jnp.zeros((EMB,), f32),
            c1_w=0.05 * jax.random.normal(next(ks), (EMB, EMB), f32),   # conv1 (k=1)
            c1_b=0.02 * jax.random.normal(next(ks), (EMB,), f32),
            c2_w=0.05 * jax.random.normal(next(ks), (EMB, EMB), f32),   # conv2 (k=1)
            c2_b=0.02 * jax.random.normal(next(ks), (EMB,), f32),
        ))
    return params


def pack_params(p):
    """Repack torch-layout params into 3 kernel-ready slabs (8-row-aligned offsets)."""
    D = EMB
    scale = float(D) ** 0.5

    s32 = np.zeros((S32_ROWS, D), np.float32)
    s32[ITEM_OFF:ITEM_OFF + ITEM_NUM + 2] = np.asarray(p["item_emb"])
    s32[POS_OFF:POS_OFF + MAX_LEN + 2] = np.asarray(p["pos_emb"])
    s32[WGATE_OFF:WGATE_OFF + D, :N_EXPS] = np.asarray(p["w_gate"])
    s32[LNF_OFF] = np.asarray(p["lnf_g"])
    s32[LNF_OFF + 1] = np.asarray(p["lnf_b"])

    qkv = np.zeros((N_BLOCKS, QKV_ROWS, 3 * D), np.float32)
    for bi, b in enumerate(p["blocks"]):
        base = BLK0_OFF + bi * BLK_STRIDE
        s32[base + R_LN1G] = np.asarray(b["ln1_g"])
        s32[base + R_LN1B] = np.asarray(b["ln1_b"])
        s32[base + R_LN2G] = np.asarray(b["ln2_g"])
        s32[base + R_LN2B] = np.asarray(b["ln2_b"])
        s32[base + R_BOUT] = np.asarray(b["out_b"])
        s32[base + R_BC1] = np.asarray(b["c1_b"])
        s32[base + R_BC2] = np.asarray(b["c2_b"])
        s32[base + R_WOUT:base + R_WOUT + D] = np.asarray(b["out_w"]).T
        s32[base + R_WC1:base + R_WC1 + D] = np.asarray(b["c1_w"]).T
        s32[base + R_WC2:base + R_WC2 + D] = np.asarray(b["c2_w"]).T
        qkv[bi, :D, :] = np.asarray(b["in_w"]).T          # [D, 3D] : cols = Q | K | V
        qkv[bi, D, :] = np.asarray(b["in_b"])

    # MoE: PWLayer_i(x) = (x - b_i) @ W_i.T == x @ W_i.T - (b_i @ W_i.T); sqrt(D) folded in.
    moe = np.zeros((MOE_ROWS, N_EXPS * D), np.float32)
    e_wT = np.transpose(np.asarray(p["e_w"]), (0, 2, 1))                    # [E, in, out]
    ew_stk = np.transpose(e_wT, (1, 0, 2)).reshape(D, N_EXPS * D)           # [in, E*out]
    ecorr = np.einsum("ei,eio->eo", np.asarray(p["e_bias"]), e_wT).reshape(N_EXPS * D)
    moe[EW_OFF:EW_OFF + D] = scale * ew_stk
    moe[ECORR_OFF] = scale * ecorr
    moe[B1_OFF:B1_OFF + N_EXPS] = np.kron(np.eye(N_EXPS), np.ones((1, D)))  # [E, E*D]
    moe[B2_OFF:B2_OFF + D] = np.kron(np.ones((1, N_EXPS)), np.eye(D))       # B2^T [D, E*D]

    return {"s32": jnp.asarray(s32), "moe": jnp.asarray(moe), "qkv": jnp.asarray(qkv)}


# ---------------- pure-JAX reference (mirrors the torch forward, eval mode) ----------------
def _ln_ref(v, g, b):
    mu = jnp.mean(v, axis=-1, keepdims=True)
    var = jnp.mean((v - mu) ** 2, axis=-1, keepdims=True)
    return (v - mu) / jnp.sqrt(var + LN_EPS) * g + b


def reference_forward(seq, pos, p):
    B, L = seq.shape
    D, HD = EMB, HEAD_DIM
    x = p["item_emb"][seq.reshape(-1)]
    gates = jax.nn.softmax(x @ p["w_gate"], axis=-1)
    moe = sum(gates[:, e:e + 1] * ((x - p["e_bias"][e]) @ p["e_w"][e].T)
              for e in range(N_EXPS))
    h = moe * (D ** 0.5) + p["pos_emb"][pos.reshape(-1)]
    mask = (seq.reshape(-1, 1) != 0).astype(jnp.float32)
    h = h * mask
    ids = jnp.arange(B * L)
    allowed = ((ids[:, None] // L) == (ids[None, :] // L)) & \
              ((ids[None, :] % L) <= (ids[:, None] % L))
    bias = jnp.where(allowed, 0.0, -1e30)
    for b in p["blocks"]:
        hn = _ln_ref(h, b["ln1_g"], b["ln1_b"])
        q = hn @ b["in_w"][:D].T + b["in_b"][:D]
        k = h @ b["in_w"][D:2 * D].T + b["in_b"][D:2 * D]
        v = h @ b["in_w"][2 * D:].T + b["in_b"][2 * D:]
        heads = []
        for hh in range(N_HEADS):
            sl = slice(hh * HD, (hh + 1) * HD)
            s = (q[:, sl] @ k[:, sl].T) / math.sqrt(HD) + bias
            heads.append(jax.nn.softmax(s, axis=-1) @ v[:, sl])
        attn = jnp.concatenate(heads, axis=-1) @ b["out_w"].T + b["out_b"]
        h2 = _ln_ref(hn + attn, b["ln2_g"], b["ln2_b"])
        y = jax.nn.gelu(h2 @ b["c1_w"].T + b["c1_b"], approximate=True)
        y = y @ b["c2_w"].T + b["c2_b"]
        h = (y + h2) * mask
    return _ln_ref(h, p["lnf_g"], p["lnf_b"]).reshape(B, L, D)


if __name__ == "__main__":
    key = jax.random.PRNGKey(0)
    k_param, k_seq = jax.random.split(key)
    params = make_params(k_param)
    kp = pack_params(params)

    # seq ids in [1, ITEM_NUM], with a couple of padding zeros; pos = 1..L
    seq = jax.random.randint(k_seq, (BATCH, MAX_LEN), 1, ITEM_NUM + 1, dtype=jnp.int32)
    seq = seq.at[:, :2].set(0)
    pos = jnp.broadcast_to(jnp.arange(1, MAX_LEN + 1, dtype=jnp.int32), (BATCH, MAX_LEN))

    out = jax.block_until_ready(unisrec_forward(seq, pos, kp))
    assert out.shape == (BATCH, MAX_LEN, EMB)
    assert bool(jnp.all(jnp.isfinite(out)))

    # numerical sanity check vs. the un-fused reference (approx reciprocals -> loose tol)
    ref = reference_forward(seq, pos, params)
    np.testing.assert_allclose(np.asarray(out), np.asarray(ref), atol=1e-2, rtol=1e-2)

    print("KERNEL_OK")
</pallas_src>

<mosaic_0001>
module attributes {stable_mosaic.version = 11 : i64} {
  func.func @unisrec_kernel(%arg0: i32, %arg1: memref<16x2xi32, #tpu.memory_space<vmem>>, %arg2: memref<320x32xf32, #tpu.memory_space<vmem>>, %arg3: memref<80x256xf32, #tpu.memory_space<vmem>>, %arg4: memref<2x40x96xf32, #tpu.memory_space<vmem>>, %arg5: memref<16x32xf32, #tpu.memory_space<vmem>>, %arg6: memref<32x32xf32, #tpu.memory_space<vmem>>) attributes {dimension_semantics = [#tpu.dimension_semantics<arbitrary>], iteration_bounds = array<i64: 1>, scalar_prefetch = 0 : i64, scratch_operands = 1 : i64, tpu.core_type = #tpu.core_type<tc>, window_params = [{pipeline_mode = #tpu.pipeline_mode<synchronous>, transform_indices = @transform_0, window_bounds = array<i64: 16, 2>}, {pipeline_mode = #tpu.pipeline_mode<synchronous>, transform_indices = @transform_1, window_bounds = array<i64: 320, 32>}, {pipeline_mode = #tpu.pipeline_mode<synchronous>, transform_indices = @transform_2, window_bounds = array<i64: 80, 256>}, {pipeline_mode = #tpu.pipeline_mode<synchronous>, transform_indices = @transform_3, window_bounds = array<i64: 2, 40, 96>}, {pipeline_mode = #tpu.pipeline_mode<synchronous>, transform_indices = @transform_4, window_bounds = array<i64: 16, 32>}]} {
    %c0 = arith.constant 0 : index
    %c0_0 = arith.constant 0 : index
    %0 = vector.load %arg1[%c0, %c0_0] : memref<16x2xi32, #tpu.memory_space<vmem>>, vector<16x2xi32>
    %1 = vector.extract_strided_slice %0 {offsets = [0, 0], sizes = [16, 1], strides = [1, 1]} : vector<16x2xi32> to vector<16x1xi32>
    %2 = vector.extract_strided_slice %0 {offsets = [0, 1], sizes = [16, 1], strides = [1, 1]} : vector<16x2xi32> to vector<16x1xi32>
    %c0_1 = arith.constant 0 : index
    %c0_2 = arith.constant 0 : index
    %3 = vector.load %arg2[%c0_1, %c0_2] : memref<320x32xf32, #tpu.memory_space<vmem>>, vector<56x32xf32>
    %c56 = arith.constant 56 : index
    %c0_3 = arith.constant 0 : index
    %4 = vector.load %arg2[%c56, %c0_3] : memref<320x32xf32, #tpu.memory_space<vmem>>, vector<16x32xf32>
    %5 = tpu.iota {dimensions = array<i32: 1>} : vector<16x56xi32>
    %6 = vector.broadcast %1 : vector<16x1xi32> to vector<16x56xi32>
    %7 = arith.cmpi eq, %5, %6 : vector<16x56xi32>
    %8 = arith.extui %7 : vector<16x56xi1> to vector<16x56xi32>
    %9 = arith.sitofp %8 : vector<16x56xi32> to vector<16x56xf32>
    %10 = tpu.iota {dimensions = array<i32: 1>} : vector<16x16xi32>
    %11 = vector.broadcast %2 : vector<16x1xi32> to vector<16x16xi32>
    %12 = arith.cmpi eq, %10, %11 : vector<16x16xi32>
    %13 = arith.extui %12 : vector<16x16xi1> to vector<16x16xi32>
    %14 = arith.sitofp %13 : vector<16x16xi32> to vector<16x16xf32>
    %cst = arith.constant dense<0.000000e+00> : vector<16x32xf32>
    %15 = tpu.matmul %9, %3, %cst {dimension_numbers = #tpu.dot_dimension_numbers<[1], [0], [0], [1], [0, 0, 1, 1], [], []>} : vector<16x56xf32>, vector<56x32xf32>, vector<16x32xf32> -> vector<16x32xf32>
    %cst_4 = arith.constant dense<0.000000e+00> : vector<16x32xf32>
    %16 = tpu.matmul %14, %4, %cst_4 {dimension_numbers = #tpu.dot_dimension_numbers<[1], [0], [0], [1], [0, 0, 1, 1], [], []>} : vector<16x16xf32>, vector<16x32xf32>, vector<16x32xf32> -> vector<16x32xf32>
    %c0_i32 = arith.constant 0 : i32
    %17 = vector.broadcast %c0_i32 : i32 to vector<16x1xi32>
    %18 = arith.cmpi ne, %1, %17 : vector<16x1xi32>
    %19 = arith.extui %18 : vector<16x1xi1> to vector<16x1xi32>
    %20 = arith.sitofp %19 : vector<16x1xi32> to vector<16x1xf32>
    %21 = tpu.iota {dimensions = array<i32: 0>} : vector<16x16xi32>
    %22 = tpu.iota {dimensions = array<i32: 1>} : vector<16x16xi32>
    %c3_i32 = arith.constant 3 : i32
    %23 = vector.broadcast %c3_i32 : i32 to vector<16x16xi32>
    %24 = arith.shrsi %21, %23 : vector<16x16xi32>
    %c3_i32_5 = arith.constant 3 : i32
    %25 = vector.broadcast %c3_i32_5 : i32 to vector<16x16xi32>
    %26 = arith.shrsi %22, %25 : vector<16x16xi32>
    %27 = arith.cmpi eq, %24, %26 : vector<16x16xi32>
    %c7_i32 = arith.constant 7 : i32
    %28 = vector.broadcast %c7_i32 : i32 to vector<16x16xi32>
    %29 = arith.andi %22, %28 : vector<16x16xi32>
    %c7_i32_6 = arith.constant 7 : i32
    %30 = vector.broadcast %c7_i32_6 : i32 to vector<16x16xi32>
    %31 = arith.andi %21, %30 : vector<16x16xi32>
    %32 = arith.cmpi sle, %29, %31 : vector<16x16xi32>
    %33 = arith.andi %27, %32 : vector<16x16xi1>
    %cst_7 = arith.constant 0.000000e+00 : f32
    %cst_8 = arith.constant -1.000000e+30 : f32
    %34 = vector.broadcast %cst_7 : f32 to vector<16x16xf32>
    %35 = vector.broadcast %cst_8 : f32 to vector<16x16xf32>
    %36 = arith.select %33, %34, %35 : vector<16x16xi1>, vector<16x16xf32>
    %c72 = arith.constant 72 : index
    %c0_9 = arith.constant 0 : index
    %37 = vector.load %arg2[%c72, %c0_9] : memref<320x32xf32, #tpu.memory_space<vmem>>, vector<32x8xf32>
    %cst_10 = arith.constant dense<0.000000e+00> : vector<16x8xf32>
    %38 = tpu.matmul %15, %37, %cst_10 {dimension_numbers = #tpu.dot_dimension_numbers<[1], [0], [0], [1], [0, 0, 1, 1], [], []>} : vector<16x32xf32>, vector<32x8xf32>, vector<16x8xf32> -> vector<16x8xf32>
    %cst_11 = arith.constant dense<0xFF800000> : vector<16xf32>
    %39 = vector.multi_reduction <maximumf>, %38, %cst_11 [1] : vector<16x8xf32> to vector<16xf32>
    %40 = vector.shape_cast %39 : vector<16xf32> to vector<16x1xf32>
    %41 = vector.broadcast %40 : vector<16x1xf32> to vector<16x8xf32>
    %42 = arith.subf %38, %41 : vector<16x8xf32>
    %43 = math.exp %42 : vector<16x8xf32>
    %cst_12 = arith.constant dense<0.000000e+00> : vector<16xf32>
    %44 = vector.multi_reduction <add>, %43, %cst_12 [1] : vector<16x8xf32> to vector<16xf32>
    %45 = vector.shape_cast %44 : vector<16xf32> to vector<16x1xf32>
    %46 = tpu.reciprocal %45 {approx = true} : vector<16x1xf32> -> vector<16x1xf32>
    %47 = vector.broadcast %46 : vector<16x1xf32> to vector<16x8xf32>
    %48 = arith.mulf %43, %47 : vector<16x8xf32>
    %c0_13 = arith.constant 0 : index
    %c0_14 = arith.constant 0 : index
    %49 = vector.load %arg3[%c0_13, %c0_14] : memref<80x256xf32, #tpu.memory_space<vmem>>, vector<32x256xf32>
    %c32 = arith.constant 32 : index
    %c0_15 = arith.constant 0 : index
    %50 = vector.load %arg3[%c32, %c0_15] : memref<80x256xf32, #tpu.memory_space<vmem>>, vector<1x256xf32>
    %c40 = arith.constant 40 : index
    %c0_16 = arith.constant 0 : index
    %51 = vector.load %arg3[%c40, %c0_16] : memref<80x256xf32, #tpu.memory_space<vmem>>, vector<8x256xf32>
    %c48 = arith.constant 48 : index
    %c0_17 = arith.constant 0 : index
    %52 = vector.load %arg3[%c48, %c0_17] : memref<80x256xf32, #tpu.memory_space<vmem>>, vector<32x256xf32>
    %cst_18 = arith.constant dense<0.000000e+00> : vector<16x256xf32>
    %53 = tpu.matmul %15, %49, %cst_18 {dimension_numbers = #tpu.dot_dimension_numbers<[1], [0], [0], [1], [0, 0, 1, 1], [], []>} : vector<16x32xf32>, vector<32x256xf32>, vector<16x256xf32> -> vector<16x256xf32>
    %54 = vector.broadcast %50 : vector<1x256xf32> to vector<16x256xf32>
    %55 = arith.subf %53, %54 : vector<16x256xf32>
    %cst_19 = arith.constant dense<0.000000e+00> : vector<16x256xf32>
    %56 = tpu.matmul %48, %51, %cst_19 {dimension_numbers = #tpu.dot_dimension_numbers<[1], [0], [0], [1], [0, 0, 1, 1], [], []>} : vector<16x8xf32>, vector<8x256xf32>, vector<16x256xf32> -> vector<16x256xf32>
    %57 = arith.mulf %56, %55 : vector<16x256xf32>
    %cst_20 = arith.constant dense<0.000000e+00> : vector<16x32xf32>
    %58 = tpu.matmul %57, %52, %cst_20 {dimension_numbers = #tpu.dot_dimension_numbers<[1], [1], [0], [0], [0, 0, 1, 0], [], []>} : vector<16x256xf32>, vector<32x256xf32>, vector<16x32xf32> -> vector<16x32xf32>
    %59 = arith.addf %58, %16 : vector<16x32xf32>
    %60 = vector.broadcast %20 : vector<16x1xf32> to vector<16x32xf32>
    %61 = arith.mulf %59, %60 : vector<16x32xf32>
    %c112 = arith.constant 112 : index
    %c0_21 = arith.constant 0 : index
    %62 = vector.load %arg2[%c112, %c0_21] : memref<320x32xf32, #tpu.memory_space<vmem>>, vector<1x32xf32>
    %c113 = arith.constant 113 : index
    %c0_22 = arith.constant 0 : index
    %63 = vector.load %arg2[%c113, %c0_22] : memref<320x32xf32, #tpu.memory_space<vmem>>, vector<1x32xf32>
    %c114 = arith.constant 114 : index
    %c0_23 = arith.constant 0 : index
    %64 = vector.load %arg2[%c114, %c0_23] : memref<320x32xf32, #tpu.memory_space<vmem>>, vector<1x32xf32>
    %c115 = arith.constant 115 : index
    %c0_24 = arith.constant 0 : index
    %65 = vector.load %arg2[%c115, %c0_24] : memref<320x32xf32, #tpu.memory_space<vmem>>, vector<1x32xf32>
    %c116 = arith.constant 116 : index
    %c0_25 = arith.constant 0 : index
    %66 = vector.load %arg2[%c116, %c0_25] : memref<320x32xf32, #tpu.memory_space<vmem>>, vector<1x32xf32>
    %c117 = arith.constant 117 : index
    %c0_26 = arith.constant 0 : index
    %67 = vector.load %arg2[%c117, %c0_26] : memref<320x32xf32, #tpu.memory_space<vmem>>, vector<1x32xf32>
    %c118 = arith.constant 118 : index
    %c0_27 = arith.constant 0 : index
    %68 = vector.load %arg2[%c118, %c0_27] : memref<320x32xf32, #tpu.memory_space<vmem>>, vector<1x32xf32>
    %c120 = arith.constant 120 : index
    %c0_28 = arith.constant 0 : index
    %69 = vector.load %arg2[%c120, %c0_28] : memref<320x32xf32, #tpu.memory_space<vmem>>, vector<32x32xf32>
    %c152 = arith.constant 152 : index
    %c0_29 = arith.constant 0 : index
    %70 = vector.load %arg2[%c152, %c0_29] : memref<320x32xf32, #tpu.memory_space<vmem>>, vector<32x32xf32>
    %c184 = arith.constant 184 : index
    %c0_30 = arith.constant 0 : index
    %71 = vector.load %arg2[%c184, %c0_30] : memref<320x32xf32, #tpu.memory_space<vmem>>, vector<32x32xf32>
    %c0_31 = arith.constant 0 : index
    %c0_32 = arith.constant 0 : index
    %c0_33 = arith.constant 0 : index
    %72 = vector.load %arg4[%c0_31, %c0_32, %c0_33] : memref<2x40x96xf32, #tpu.memory_space<vmem>>, vector<1x40x96xf32>
    %73 = vector.shape_cast %72 : vector<1x40x96xf32> to vector<40x96xf32>
    %74 = vector.extract_strided_slice %73 {offsets = [0, 0], sizes = [32, 96], strides = [1, 1]} : vector<40x96xf32> to vector<32x96xf32>
    %75 = vector.extract_strided_slice %73 {offsets = [32, 0], sizes = [1, 96], strides = [1, 1]} : vector<40x96xf32> to vector<1x96xf32>
    %cst_34 = arith.constant dense<0.000000e+00> : vector<16xf32>
    %76 = vector.multi_reduction <add>, %61, %cst_34 [1] : vector<16x32xf32> to vector<16xf32>
    %77 = vector.shape_cast %76 : vector<16xf32> to vector<16x1xf32>
    %cst_35 = arith.constant 3.200000e+01 : f32
    %78 = vector.broadcast %cst_35 : f32 to vector<16x1xf32>
    %79 = arith.divf %77, %78 : vector<16x1xf32>
    %80 = vector.broadcast %79 : vector<16x1xf32> to vector<16x32xf32>
    %81 = arith.subf %61, %80 : vector<16x32xf32>
    %82 = arith.mulf %81, %81 : vector<16x32xf32>
    %cst_36 = arith.constant dense<0.000000e+00> : vector<16xf32>
    %83 = vector.multi_reduction <add>, %82, %cst_36 [1] : vector<16x32xf32> to vector<16xf32>
    %84 = vector.shape_cast %83 : vector<16xf32> to vector<16x1xf32>
    %cst_37 = arith.constant 3.200000e+01 : f32
    %85 = vector.broadcast %cst_37 : f32 to vector<16x1xf32>
    %86 = arith.divf %84, %85 : vector<16x1xf32>
    %87 = vector.broadcast %79 : vector<16x1xf32> to vector<16x32xf32>
    %88 = arith.subf %61, %87 : vector<16x32xf32>
    %cst_38 = arith.constant 9.99999993E-9 : f32
    %89 = vector.broadcast %cst_38 : f32 to vector<16x1xf32>
    %90 = arith.addf %86, %89 : vector<16x1xf32>
    %91 = math.rsqrt %90 : vector<16x1xf32>
    %92 = vector.broadcast %91 : vector<16x1xf32> to vector<16x32xf32>
    %93 = arith.mulf %88, %92 : vector<16x32xf32>
    %94 = vector.broadcast %62 : vector<1x32xf32> to vector<16x32xf32>
    %95 = arith.mulf %93, %94 : vector<16x32xf32>
    %96 = vector.broadcast %63 : vector<1x32xf32> to vector<16x32xf32>
    %97 = arith.addf %95, %96 : vector<16x32xf32>
    %c0_39 = arith.constant 0 : index
    %c0_40 = arith.constant 0 : index
    %98 = vector.load %arg6[%c0_39, %c0_40] : memref<32x32xf32, #tpu.memory_space<vmem>>, vector<16x32xf32>
    tpu.vector_store %arg6[%c0_39, %c0_40], %97 {strides = array<i32>} : memref<32x32xf32, #tpu.memory_space<vmem>>, vector<16x32xf32>,
    %c16 = arith.constant 16 : index
    %c0_41 = arith.constant 0 : index
    %99 = vector.load %arg6[%c16, %c0_41] : memref<32x32xf32, #tpu.memory_space<vmem>>, vector<16x32xf32>
    tpu.vector_store %arg6[%c16, %c0_41], %61 {strides = array<i32>} : memref<32x32xf32, #tpu.memory_space<vmem>>, vector<16x32xf32>,
    %c0_42 = arith.constant 0 : index
    %c0_43 = arith.constant 0 : index
    %100 = vector.load %arg6[%c0_42, %c0_43] : memref<32x32xf32, #tpu.memory_space<vmem>>, vector<32x32xf32>
    %cst_44 = arith.constant dense<0.000000e+00> : vector<32x96xf32>
    %101 = tpu.matmul %100, %74, %cst_44 {dimension_numbers = #tpu.dot_dimension_numbers<[1], [0], [0], [1], [0, 0, 1, 1], [], []>} : vector<32x32xf32>, vector<32x96xf32>, vector<32x96xf32> -> vector<32x96xf32>
    %102 = vector.broadcast %75 : vector<1x96xf32> to vector<32x96xf32>
    %103 = arith.addf %101, %102 : vector<32x96xf32>
    %104 = vector.extract_strided_slice %103 {offsets = [0, 0], sizes = [16, 32], strides = [1, 1]} : vector<32x96xf32> to vector<16x32xf32>
    %105 = vector.extract_strided_slice %103 {offsets = [16, 32], sizes = [16, 32], strides = [1, 1]} : vector<32x96xf32> to vector<16x32xf32>
    %106 = vector.extract_strided_slice %103 {offsets = [16, 64], sizes = [16, 32], strides = [1, 1]} : vector<32x96xf32> to vector<16x32xf32>
    %107 = vector.extract_strided_slice %104 {offsets = [0, 0], sizes = [16, 16], strides = [1, 1]} : vector<16x32xf32> to vector<16x16xf32>
    %108 = vector.extract_strided_slice %105 {offsets = [0, 0], sizes = [16, 16], strides = [1, 1]} : vector<16x32xf32> to vector<16x16xf32>
    %cst_45 = arith.constant dense<0.000000e+00> : vector<16x16xf32>
    %109 = tpu.matmul %107, %108, %cst_45 {dimension_numbers = #tpu.dot_dimension_numbers<[1], [1], [0], [0], [0, 0, 1, 0], [], []>} : vector<16x16xf32>, vector<16x16xf32>, vector<16x16xf32> -> vector<16x16xf32>
    %cst_46 = arith.constant 2.500000e-01 : f32
    %110 = vector.broadcast %cst_46 : f32 to vector<16x16xf32>
    %111 = arith.mulf %109, %110 : vector<16x16xf32>
    %112 = arith.addf %111, %36 : vector<16x16xf32>
    %cst_47 = arith.constant dense<0xFF800000> : vector<16xf32>
    %113 = vector.multi_reduction <maximumf>, %112, %cst_47 [1] : vector<16x16xf32> to vector<16xf32>
    %114 = vector.shape_cast %113 : vector<16xf32> to vector<16x1xf32>
    %115 = vector.broadcast %114 : vector<16x1xf32> to vector<16x16xf32>
    %116 = arith.subf %112, %115 : vector<16x16xf32>
    %117 = math.exp %116 : vector<16x16xf32>
    %cst_48 = arith.constant dense<0.000000e+00> : vector<16xf32>
    %118 = vector.multi_reduction <add>, %117, %cst_48 [1] : vector<16x16xf32> to vector<16xf32>
    %119 = vector.shape_cast %118 : vector<16xf32> to vector<16x1xf32>
    %120 = tpu.reciprocal %119 {approx = true} : vector<16x1xf32> -> vector<16x1xf32>
    %121 = vector.broadcast %120 : vector<16x1xf32> to vector<16x16xf32>
    %122 = arith.mulf %117, %121 : vector<16x16xf32>
    %123 = vector.extract_strided_slice %106 {offsets = [0, 0], sizes = [16, 16], strides = [1, 1]} : vector<16x32xf32> to vector<16x16xf32>
    %cst_49 = arith.constant dense<0.000000e+00> : vector<16x16xf32>
    %124 = tpu.matmul %122, %123, %cst_49 {dimension_numbers = #tpu.dot_dimension_numbers<[1], [0], [0], [1], [0, 0, 1, 1], [], []>} : vector<16x16xf32>, vector<16x16xf32>, vector<16x16xf32> -> vector<16x16xf32>
    %125 = vector.extract_strided_slice %69 {offsets = [0, 0], sizes = [16, 32], strides = [1, 1]} : vector<32x32xf32> to vector<16x32xf32>
    %cst_50 = arith.constant dense<0.000000e+00> : vector<16x32xf32>
    %126 = tpu.matmul %124, %125, %cst_50 {dimension_numbers = #tpu.dot_dimension_numbers<[1], [0], [0], [1], [0, 0, 1, 1], [], []>} : vector<16x16xf32>, vector<16x32xf32>, vector<16x32xf32> -> vector<16x32xf32>
    %127 = vector.broadcast %66 : vector<1x32xf32> to vector<16x32xf32>
    %128 = arith.addf %127, %126 : vector<16x32xf32>
    %129 = vector.extract_strided_slice %104 {offsets = [0, 16], sizes = [16, 16], strides = [1, 1]} : vector<16x32xf32> to vector<16x16xf32>
    %130 = vector.extract_strided_slice %105 {offsets = [0, 16], sizes = [16, 16], strides = [1, 1]} : vector<16x32xf32> to vector<16x16xf32>
    %cst_51 = arith.constant dense<0.000000e+00> : vector<16x16xf32>
    %131 = tpu.matmul %129, %130, %cst_51 {dimension_numbers = #tpu.dot_dimension_numbers<[1], [1], [0], [0], [0, 0, 1, 0], [], []>} : vector<16x16xf32>, vector<16x16xf32>, vector<16x16xf32> -> vector<16x16xf32>
    %cst_52 = arith.constant 2.500000e-01 : f32
    %132 = vector.broadcast %cst_52 : f32 to vector<16x16xf32>
    %133 = arith.mulf %131, %132 : vector<16x16xf32>
    %134 = arith.addf %133, %36 : vector<16x16xf32>
    %cst_53 = arith.constant dense<0xFF800000> : vector<16xf32>
    %135 = vector.multi_reduction <maximumf>, %134, %cst_53 [1] : vector<16x16xf32> to vector<16xf32>
    %136 = vector.shape_cast %135 : vector<16xf32> to vector<16x1xf32>
    %137 = vector.broadcast %136 : vector<16x1xf32> to vector<16x16xf32>
    %138 = arith.subf %134, %137 : vector<16x16xf32>
    %139 = math.exp %138 : vector<16x16xf32>
    %cst_54 = arith.constant dense<0.000000e+00> : vector<16xf32>
    %140 = vector.multi_reduction <add>, %139, %cst_54 [1] : vector<16x16xf32> to vector<16xf32>
    %141 = vector.shape_cast %140 : vector<16xf32> to vector<16x1xf32>
    %142 = tpu.reciprocal %141 {approx = true} : vector<16x1xf32> -> vector<16x1xf32>
    %143 = vector.broadcast %142 : vector<16x1xf32> to vector<16x16xf32>
    %144 = arith.mulf %139, %143 : vector<16x16xf32>
    %145 = vector.extract_strided_slice %106 {offsets = [0, 16], sizes = [16, 16], strides = [1, 1]} : vector<16x32xf32> to vector<16x16xf32>
    %cst_55 = arith.constant dense<0.000000e+00> : vector<16x16xf32>
    %146 = tpu.matmul %144, %145, %cst_55 {dimension_numbers = #tpu.dot_dimension_numbers<[1], [0], [0], [1], [0, 0, 1, 1], [], []>} : vector<16x16xf32>, vector<16x16xf32>, vector<16x16xf32> -> vector<16x16xf32>
    %147 = vector.extract_strided_slice %69 {offsets = [16, 0], sizes = [16, 32], strides = [1, 1]} : vector<32x32xf32> to vector<16x32xf32>
    %cst_56 = arith.constant dense<0.000000e+00> : vector<16x32xf32>
    %148 = tpu.matmul %146, %147, %cst_56 {dimension_numbers = #tpu.dot_dimension_numbers<[1], [0], [0], [1], [0, 0, 1, 1], [], []>} : vector<16x16xf32>, vector<16x32xf32>, vector<16x32xf32> -> vector<16x32xf32>
    %149 = arith.addf %128, %148 : vector<16x32xf32>
    %150 = arith.addf %97, %149 : vector<16x32xf32>
    %cst_57 = arith.constant dense<0.000000e+00> : vector<16xf32>
    %151 = vector.multi_reduction <add>, %150, %cst_57 [1] : vector<16x32xf32> to vector<16xf32>
    %152 = vector.shape_cast %151 : vector<16xf32> to vector<16x1xf32>
    %cst_58 = arith.constant 3.200000e+01 : f32
    %153 = vector.broadcast %cst_58 : f32 to vector<16x1xf32>
    %154 = arith.divf %152, %153 : vector<16x1xf32>
    %155 = vector.broadcast %154 : vector<16x1xf32> to vector<16x32xf32>
    %156 = arith.subf %150, %155 : vector<16x32xf32>
    %157 = arith.mulf %156, %156 : vector<16x32xf32>
    %cst_59 = arith.constant dense<0.000000e+00> : vector<16xf32>
    %158 = vector.multi_reduction <add>, %157, %cst_59 [1] : vector<16x32xf32> to vector<16xf32>
    %159 = vector.shape_cast %158 : vector<16xf32> to vector<16x1xf32>
    %cst_60 = arith.constant 3.200000e+01 : f32
    %160 = vector.broadcast %cst_60 : f32 to vector<16x1xf32>
    %161 = arith.divf %159, %160 : vector<16x1xf32>
    %162 = vector.broadcast %154 : vector<16x1xf32> to vector<16x32xf32>
    %163 = arith.subf %150, %162 : vector<16x32xf32>
    %cst_61 = arith.constant 9.99999993E-9 : f32
    %164 = vector.broadcast %cst_61 : f32 to vector<16x1xf32>
    %165 = arith.addf %161, %164 : vector<16x1xf32>
    %166 = math.rsqrt %165 : vector<16x1xf32>
    %167 = vector.broadcast %166 : vector<16x1xf32> to vector<16x32xf32>
    %168 = arith.mulf %163, %167 : vector<16x32xf32>
    %169 = vector.broadcast %64 : vector<1x32xf32> to vector<16x32xf32>
    %170 = arith.mulf %168, %169 : vector<16x32xf32>
    %171 = vector.broadcast %65 : vector<1x32xf32> to vector<16x32xf32>
    %172 = arith.addf %170, %171 : vector<16x32xf32>
    %cst_62 = arith.constant dense<0.000000e+00> : vector<16x32xf32>
    %173 = tpu.matmul %172, %70, %cst_62 {dimension_numbers = #tpu.dot_dimension_numbers<[1], [0], [0], [1], [0, 0, 1, 1], [], []>} : vector<16x32xf32>, vector<32x32xf32>, vector<16x32xf32> -> vector<16x32xf32>
    %174 = vector.broadcast %67 : vector<1x32xf32> to vector<16x32xf32>
    %175 = arith.addf %173, %174 : vector<16x32xf32>
    %176 = arith.mulf %175, %175 : vector<16x32xf32>
    %177 = arith.mulf %175, %176 : vector<16x32xf32>
    %cst_63 = arith.constant 4.471500e-02 : f32
    %178 = vector.broadcast %cst_63 : f32 to vector<16x32xf32>
    %179 = arith.mulf %178, %177 : vector<16x32xf32>
    %180 = arith.addf %175, %179 : vector<16x32xf32>
    %cst_64 = arith.constant 0.797884583 : f32
    %181 = vector.broadcast %cst_64 : f32 to vector<16x32xf32>
    %182 = arith.mulf %181, %180 : vector<16x32xf32>
    %183 = math.tanh %182 : vector<16x32xf32>
    %cst_65 = arith.constant 1.000000e+00 : f32
    %184 = vector.broadcast %cst_65 : f32 to vector<16x32xf32>
    %185 = arith.addf %184, %183 : vector<16x32xf32>
    %cst_66 = arith.constant 5.000000e-01 : f32
    %186 = vector.broadcast %cst_66 : f32 to vector<16x32xf32>
    %187 = arith.mulf %186, %185 : vector<16x32xf32>
    %188 = arith.mulf %175, %187 : vector<16x32xf32>
    %cst_67 = arith.constant dense<0.000000e+00> : vector<16x32xf32>
    %189 = tpu.matmul %188, %71, %cst_67 {dimension_numbers = #tpu.dot_dimension_numbers<[1], [0], [0], [1], [0, 0, 1, 1], [], []>} : vector<16x32xf32>, vector<32x32xf32>, vector<16x32xf32> -> vector<16x32xf32>
    %190 = vector.broadcast %68 : vector<1x32xf32> to vector<16x32xf32>
    %191 = arith.addf %189, %190 : vector<16x32xf32>
    %192 = arith.addf %191, %172 : vector<16x32xf32>
    %193 = vector.broadcast %20 : vector<16x1xf32> to vector<16x32xf32>
    %194 = arith.mulf %192, %193 : vector<16x32xf32>
    %c216 = arith.constant 216 : index
    %c0_68 = arith.constant 0 : index
    %195 = vector.load %arg2[%c216, %c0_68] : memref<320x32xf32, #tpu.memory_space<vmem>>, vector<1x32xf32>
    %c217 = arith.constant 217 : index
    %c0_69 = arith.constant 0 : index
    %196 = vector.load %arg2[%c217, %c0_69] : memref<320x32xf32, #tpu.memory_space<vmem>>, vector<1x32xf32>
    %c218 = arith.constant 218 : index
    %c0_70 = arith.constant 0 : index
    %197 = vector.load %arg2[%c218, %c0_70] : memref<320x32xf32, #tpu.memory_space<vmem>>, vector<1x32xf32>
    %c219 = arith.constant 219 : index
    %c0_71 = arith.constant 0 : index
    %198 = vector.load %arg2[%c219, %c0_71] : memref<320x32xf32, #tpu.memory_space<vmem>>, vector<1x32xf32>
    %c220 = arith.constant 220 : index
    %c0_72 = arith.constant 0 : index
    %199 = vector.load %arg2[%c220, %c0_72] : memref<320x32xf32, #tpu.memory_space<vmem>>, vector<1x32xf32>
    %c221 = arith.constant 221 : index
    %c0_73 = arith.constant 0 : index
    %200 = vector.load %arg2[%c221, %c0_73] : memref<320x32xf32, #tpu.memory_space<vmem>>, vector<1x32xf32>
    %c222 = arith.constant 222 : index
    %c0_74 = arith.constant 0 : index
    %201 = vector.load %arg2[%c222, %c0_74] : memref<320x32xf32, #tpu.memory_space<vmem>>, vector<1x32xf32>
    %c224 = arith.constant 224 : index
    %c0_75 = arith.constant 0 : index
    %202 = vector.load %arg2[%c224, %c0_75] : memref<320x32xf32, #tpu.memory_space<vmem>>, vector<32x32xf32>
    %c256 = arith.constant 256 : index
    %c0_76 = arith.constant 0 : index
    %203 = vector.load %arg2[%c256, %c0_76] : memref<320x32xf32, #tpu.memory_space<vmem>>, vector<32x32xf32>
    %c288 = arith.constant 288 : index
    %c0_77 = arith.constant 0 : index
    %204 = vector.load %arg2[%c288, %c0_77] : memref<320x32xf32, #tpu.memory_space<vmem>>, vector<32x32xf32>
    %c1 = arith.constant 1 : index
    %c0_78 = arith.constant 0 : index
    %c0_79 = arith.constant 0 : index
    %205 = vector.load %arg4[%c1, %c0_78, %c0_79] : memref<2x40x96xf32, #tpu.memory_space<vmem>>, vector<1x40x96xf32>
    %206 = vector.shape_cast %205 : vector<1x40x96xf32> to vector<40x96xf32>
    %207 = vector.extract_strided_slice %206 {offsets = [0, 0], sizes = [32, 96], strides = [1, 1]} : vector<40x96xf32> to vector<32x96xf32>
    %208 = vector.extract_strided_slice %206 {offsets = [32, 0], sizes = [1, 96], strides = [1, 1]} : vector<40x96xf32> to vector<1x96xf32>
    %cst_80 = arith.constant dense<0.000000e+00> : vector<16xf32>
    %209 = vector.multi_reduction <add>, %194, %cst_80 [1] : vector<16x32xf32> to vector<16xf32>
    %210 = vector.shape_cast %209 : vector<16xf32> to vector<16x1xf32>
    %cst_81 = arith.constant 3.200000e+01 : f32
    %211 = vector.broadcast %cst_81 : f32 to vector<16x1xf32>
    %212 = arith.divf %210, %211 : vector<16x1xf32>
    %213 = vector.broadcast %212 : vector<16x1xf32> to vector<16x32xf32>
    %214 = arith.subf %194, %213 : vector<16x32xf32>
    %215 = arith.mulf %214, %214 : vector<16x32xf32>
    %cst_82 = arith.constant dense<0.000000e+00> : vector<16xf32>
    %216 = vector.multi_reduction <add>, %215, %cst_82 [1] : vector<16x32xf32> to vector<16xf32>
    %217 = vector.shape_cast %216 : vector<16xf32> to vector<16x1xf32>
    %cst_83 = arith.constant 3.200000e+01 : f32
    %218 = vector.broadcast %cst_83 : f32 to vector<16x1xf32>
    %219 = arith.divf %217, %218 : vector<16x1xf32>
    %220 = vector.broadcast %212 : vector<16x1xf32> to vector<16x32xf32>
    %221 = arith.subf %194, %220 : vector<16x32xf32>
    %cst_84 = arith.constant 9.99999993E-9 : f32
    %222 = vector.broadcast %cst_84 : f32 to vector<16x1xf32>
    %223 = arith.addf %219, %222 : vector<16x1xf32>
    %224 = math.rsqrt %223 : vector<16x1xf32>
    %225 = vector.broadcast %224 : vector<16x1xf32> to vector<16x32xf32>
    %226 = arith.mulf %221, %225 : vector<16x32xf32>
    %227 = vector.broadcast %195 : vector<1x32xf32> to vector<16x32xf32>
    %228 = arith.mulf %226, %227 : vector<16x32xf32>
    %229 = vector.broadcast %196 : vector<1x32xf32> to vector<16x32xf32>
    %230 = arith.addf %228, %229 : vector<16x32xf32>
    %c0_85 = arith.constant 0 : index
    %c0_86 = arith.constant 0 : index
    %231 = vector.load %arg6[%c0_85, %c0_86] : memref<32x32xf32, #tpu.memory_space<vmem>>, vector<16x32xf32>
    tpu.vector_store %arg6[%c0_85, %c0_86], %230 {strides = array<i32>} : memref<32x32xf32, #tpu.memory_space<vmem>>, vector<16x32xf32>,
    %c16_87 = arith.constant 16 : index
    %c0_88 = arith.constant 0 : index
    %232 = vector.load %arg6[%c16_87, %c0_88] : memref<32x32xf32, #tpu.memory_space<vmem>>, vector<16x32xf32>
    tpu.vector_store %arg6[%c16_87, %c0_88], %194 {strides = array<i32>} : memref<32x32xf32, #tpu.memory_space<vmem>>, vector<16x32xf32>,
    %c0_89 = arith.constant 0 : index
    %c0_90 = arith.constant 0 : index
    %233 = vector.load %arg6[%c0_89, %c0_90] : memref<32x32xf32, #tpu.memory_space<vmem>>, vector<32x32xf32>
    %cst_91 = arith.constant dense<0.000000e+00> : vector<32x96xf32>
    %234 = tpu.matmul %233, %207, %cst_91 {dimension_numbers = #tpu.dot_dimension_numbers<[1], [0], [0], [1], [0, 0, 1, 1], [], []>} : vector<32x32xf32>, vector<32x96xf32>, vector<32x96xf32> -> vector<32x96xf32>
    %235 = vector.broadcast %208 : vector<1x96xf32> to vector<32x96xf32>
    %236 = arith.addf %234, %235 : vector<32x96xf32>
    %237 = vector.extract_strided_slice %236 {offsets = [0, 0], sizes = [16, 32], strides = [1, 1]} : vector<32x96xf32> to vector<16x32xf32>
    %238 = vector.extract_strided_slice %236 {offsets = [16, 32], sizes = [16, 32], strides = [1, 1]} : vector<32x96xf32> to vector<16x32xf32>
    %239 = vector.extract_strided_slice %236 {offsets = [16, 64], sizes = [16, 32], strides = [1, 1]} : vector<32x96xf32> to vector<16x32xf32>
    %240 = vector.extract_strided_slice %237 {offsets = [0, 0], sizes = [16, 16], strides = [1, 1]} : vector<16x32xf32> to vector<16x16xf32>
    %241 = vector.extract_strided_slice %238 {offsets = [0, 0], sizes = [16, 16], strides = [1, 1]} : vector<16x32xf32> to vector<16x16xf32>
    %cst_92 = arith.constant dense<0.000000e+00> : vector<16x16xf32>
    %242 = tpu.matmul %240, %241, %cst_92 {dimension_numbers = #tpu.dot_dimension_numbers<[1], [1], [0], [0], [0, 0, 1, 0], [], []>} : vector<16x16xf32>, vector<16x16xf32>, vector<16x16xf32> -> vector<16x16xf32>
    %cst_93 = arith.constant 2.500000e-01 : f32
    %243 = vector.broadcast %cst_93 : f32 to vector<16x16xf32>
    %244 = arith.mulf %242, %243 : vector<16x16xf32>
    %245 = arith.addf %244, %36 : vector<16x16xf32>
    %cst_94 = arith.constant dense<0xFF800000> : vector<16xf32>
    %246 = vector.multi_reduction <maximumf>, %245, %cst_94 [1] : vector<16x16xf32> to vector<16xf32>
    %247 = vector.shape_cast %246 : vector<16xf32> to vector<16x1xf32>
    %248 = vector.broadcast %247 : vector<16x1xf32> to vector<16x16xf32>
    %249 = arith.subf %245, %248 : vector<16x16xf32>
    %250 = math.exp %249 : vector<16x16xf32>
    %cst_95 = arith.constant dense<0.000000e+00> : vector<16xf32>
    %251 = vector.multi_reduction <add>, %250, %cst_95 [1] : vector<16x16xf32> to vector<16xf32>
    %252 = vector.shape_cast %251 : vector<16xf32> to vector<16x1xf32>
    %253 = tpu.reciprocal %252 {approx = true} : vector<16x1xf32> -> vector<16x1xf32>
    %254 = vector.broadcast %253 : vector<16x1xf32> to vector<16x16xf32>
    %255 = arith.mulf %250, %254 : vector<16x16xf32>
    %256 = vector.extract_strided_slice %239 {offsets = [0, 0], sizes = [16, 16], strides = [1, 1]} : vector<16x32xf32> to vector<16x16xf32>
    %cst_96 = arith.constant dense<0.000000e+00> : vector<16x16xf32>
    %257 = tpu.matmul %255, %256, %cst_96 {dimension_numbers = #tpu.dot_dimension_numbers<[1], [0], [0], [1], [0, 0, 1, 1], [], []>} : vector<16x16xf32>, vector<16x16xf32>, vector<16x16xf32> -> vector<16x16xf32>
    %258 = vector.extract_strided_slice %202 {offsets = [0, 0], sizes = [16, 32], strides = [1, 1]} : vector<32x32xf32> to vector<16x32xf32>
    %cst_97 = arith.constant dense<0.000000e+00> : vector<16x32xf32>
    %259 = tpu.matmul %257, %258, %cst_97 {dimension_numbers = #tpu.dot_dimension_numbers<[1], [0], [0], [1], [0, 0, 1, 1], [], []>} : vector<16x16xf32>, vector<16x32xf32>, vector<16x32xf32> -> vector<16x32xf32>
    %260 = vector.broadcast %199 : vector<1x32xf32> to vector<16x32xf32>
    %261 = arith.addf %260, %259 : vector<16x32xf32>
    %262 = vector.extract_strided_slice %237 {offsets = [0, 16], sizes = [16, 16], strides = [1, 1]} : vector<16x32xf32> to vector<16x16xf32>
    %263 = vector.extract_strided_slice %238 {offsets = [0, 16], sizes = [16, 16], strides = [1, 1]} : vector<16x32xf32> to vector<16x16xf32>
    %cst_98 = arith.constant dense<0.000000e+00> : vector<16x16xf32>
    %264 = tpu.matmul %262, %263, %cst_98 {dimension_numbers = #tpu.dot_dimension_numbers<[1], [1], [0], [0], [0, 0, 1, 0], [], []>} : vector<16x16xf32>, vector<16x16xf32>, vector<16x16xf32> -> vector<16x16xf32>
    %cst_99 = arith.constant 2.500000e-01 : f32
    %265 = vector.broadcast %cst_99 : f32 to vector<16x16xf32>
    %266 = arith.mulf %264, %265 : vector<16x16xf32>
    %267 = arith.addf %266, %36 : vector<16x16xf32>
    %cst_100 = arith.constant dense<0xFF800000> : vector<16xf32>
    %268 = vector.multi_reduction <maximumf>, %267, %cst_100 [1] : vector<16x16xf32> to vector<16xf32>
    %269 = vector.shape_cast %268 : vector<16xf32> to vector<16x1xf32>
    %270 = vector.broadcast %269 : vector<16x1xf32> to vector<16x16xf32>
    %271 = arith.subf %267, %270 : vector<16x16xf32>
    %272 = math.exp %271 : vector<16x16xf32>
    %cst_101 = arith.constant dense<0.000000e+00> : vector<16xf32>
    %273 = vector.multi_reduction <add>, %272, %cst_101 [1] : vector<16x16xf32> to vector<16xf32>
    %274 = vector.shape_cast %273 : vector<16xf32> to vector<16x1xf32>
    %275 = tpu.reciprocal %274 {approx = true} : vector<16x1xf32> -> vector<16x1xf32>
    %276 = vector.broadcast %275 : vector<16x1xf32> to vector<16x16xf32>
    %277 = arith.mulf %272, %276 : vector<16x16xf32>
    %278 = vector.extract_strided_slice %239 {offsets = [0, 16], sizes = [16, 16], strides = [1, 1]} : vector<16x32xf32> to vector<16x16xf32>
    %cst_102 = arith.constant dense<0.000000e+00> : vector<16x16xf32>
    %279 = tpu.matmul %277, %278, %cst_102 {dimension_numbers = #tpu.dot_dimension_numbers<[1], [0], [0], [1], [0, 0, 1, 1], [], []>} : vector<16x16xf32>, vector<16x16xf32>, vector<16x16xf32> -> vector<16x16xf32>
    %280 = vector.extract_strided_slice %202 {offsets = [16, 0], sizes = [16, 32], strides = [1, 1]} : vector<32x32xf32> to vector<16x32xf32>
    %cst_103 = arith.constant dense<0.000000e+00> : vector<16x32xf32>
    %281 = tpu.matmul %279, %280, %cst_103 {dimension_numbers = #tpu.dot_dimension_numbers<[1], [0], [0], [1], [0, 0, 1, 1], [], []>} : vector<16x16xf32>, vector<16x32xf32>, vector<16x32xf32> -> vector<16x32xf32>
    %282 = arith.addf %261, %281 : vector<16x32xf32>
    %283 = arith.addf %230, %282 : vector<16x32xf32>
    %cst_104 = arith.constant dense<0.000000e+00> : vector<16xf32>
    %284 = vector.multi_reduction <add>, %283, %cst_104 [1] : vector<16x32xf32> to vector<16xf32>
    %285 = vector.shape_cast %284 : vector<16xf32> to vector<16x1xf32>
    %cst_105 = arith.constant 3.200000e+01 : f32
    %286 = vector.broadcast %cst_105 : f32 to vector<16x1xf32>
    %287 = arith.divf %285, %286 : vector<16x1xf32>
    %288 = vector.broadcast %287 : vector<16x1xf32> to vector<16x32xf32>
    %289 = arith.subf %283, %288 : vector<16x32xf32>
    %290 = arith.mulf %289, %289 : vector<16x32xf32>
    %cst_106 = arith.constant dense<0.000000e+00> : vector<16xf32>
    %291 = vector.multi_reduction <add>, %290, %cst_106 [1] : vector<16x32xf32> to vector<16xf32>
    %292 = vector.shape_cast %291 : vector<16xf32> to vector<16x1xf32>
    %cst_107 = arith.constant 3.200000e+01 : f32
    %293 = vector.broadcast %cst_107 : f32 to vector<16x1xf32>
    %294 = arith.divf %292, %293 : vector<16x1xf32>
    %295 = vector.broadcast %287 : vector<16x1xf32> to vector<16x32xf32>
    %296 = arith.subf %283, %295 : vector<16x32xf32>
    %cst_108 = arith.constant 9.99999993E-9 : f32
    %297 = vector.broadcast %cst_108 : f32 to vector<16x1xf32>
    %298 = arith.addf %294, %297 : vector<16x1xf32>
    %299 = math.rsqrt %298 : vector<16x1xf32>
    %300 = vector.broadcast %299 : vector<16x1xf32> to vector<16x32xf32>
    %301 = arith.mulf %296, %300 : vector<16x32xf32>
    %302 = vector.broadcast %197 : vector<1x32xf32> to vector<16x32xf32>
    %303 = arith.mulf %301, %302 : vector<16x32xf32>
    %304 = vector.broadcast %198 : vector<1x32xf32> to vector<16x32xf32>
    %305 = arith.addf %303, %304 : vector<16x32xf32>
    %cst_109 = arith.constant dense<0.000000e+00> : vector<16x32xf32>
    %306 = tpu.matmul %305, %203, %cst_109 {dimension_numbers = #tpu.dot_dimension_numbers<[1], [0], [0], [1], [0, 0, 1, 1], [], []>} : vector<16x32xf32>, vector<32x32xf32>, vector<16x32xf32> -> vector<16x32xf32>
    %307 = vector.broadcast %200 : vector<1x32xf32> to vector<16x32xf32>
    %308 = arith.addf %306, %307 : vector<16x32xf32>
    %309 = arith.mulf %308, %308 : vector<16x32xf32>
    %310 = arith.mulf %308, %309 : vector<16x32xf32>
    %cst_110 = arith.constant 4.471500e-02 : f32
    %311 = vector.broadcast %cst_110 : f32 to vector<16x32xf32>
    %312 = arith.mulf %311, %310 : vector<16x32xf32>
    %313 = arith.addf %308, %312 : vector<16x32xf32>
    %cst_111 = arith.constant 0.797884583 : f32
    %314 = vector.broadcast %cst_111 : f32 to vector<16x32xf32>
    %315 = arith.mulf %314, %313 : vector<16x32xf32>
    %316 = math.tanh %315 : vector<16x32xf32>
    %cst_112 = arith.constant 1.000000e+00 : f32
    %317 = vector.broadcast %cst_112 : f32 to vector<16x32xf32>
    %318 = arith.addf %317, %316 : vector<16x32xf32>
    %cst_113 = arith.constant 5.000000e-01 : f32
    %319 = vector.broadcast %cst_113 : f32 to vector<16x32xf32>
    %320 = arith.mulf %319, %318 : vector<16x32xf32>
    %321 = arith.mulf %308, %320 : vector<16x32xf32>
    %cst_114 = arith.constant dense<0.000000e+00> : vector<16x32xf32>
    %322 = tpu.matmul %321, %204, %cst_114 {dimension_numbers = #tpu.dot_dimension_numbers<[1], [0], [0], [1], [0, 0, 1, 1], [], []>} : vector<16x32xf32>, vector<32x32xf32>, vector<16x32xf32> -> vector<16x32xf32>
    %323 = vector.broadcast %201 : vector<1x32xf32> to vector<16x32xf32>
    %324 = arith.addf %322, %323 : vector<16x32xf32>
    %325 = arith.addf %324, %305 : vector<16x32xf32>
    %326 = vector.broadcast %20 : vector<16x1xf32> to vector<16x32xf32>
    %327 = arith.mulf %325, %326 : vector<16x32xf32>
    %c104 = arith.constant 104 : index
    %c0_115 = arith.constant 0 : index
    %328 = vector.load %arg2[%c104, %c0_115] : memref<320x32xf32, #tpu.memory_space<vmem>>, vector<1x32xf32>
    %c105 = arith.constant 105 : index
    %c0_116 = arith.constant 0 : index
    %329 = vector.load %arg2[%c105, %c0_116] : memref<320x32xf32, #tpu.memory_space<vmem>>, vector<1x32xf32>
    %cst_117 = arith.constant dense<0.000000e+00> : vector<16xf32>
    %330 = vector.multi_reduction <add>, %327, %cst_117 [1] : vector<16x32xf32> to vector<16xf32>
    %331 = vector.shape_cast %330 : vector<16xf32> to vector<16x1xf32>
    %cst_118 = arith.constant 3.200000e+01 : f32
    %332 = vector.broadcast %cst_118 : f32 to vector<16x1xf32>
    %333 = arith.divf %331, %332 : vector<16x1xf32>
    %334 = vector.broadcast %333 : vector<16x1xf32> to vector<16x32xf32>
    %335 = arith.subf %327, %334 : vector<16x32xf32>
    %336 = arith.mulf %335, %335 : vector<16x32xf32>
    %cst_119 = arith.constant dense<0.000000e+00> : vector<16xf32>
    %337 = vector.multi_reduction <add>, %336, %cst_119 [1] : vector<16x32xf32> to vector<16xf32>
    %338 = vector.shape_cast %337 : vector<16xf32> to vector<16x1xf32>
    %cst_120 = arith.constant 3.200000e+01 : f32
    %339 = vector.broadcast %cst_120 : f32 to vector<16x1xf32>
    %340 = arith.divf %338, %339 : vector<16x1xf32>
    %341 = vector.broadcast %333 : vector<16x1xf32> to vector<16x32xf32>
    %342 = arith.subf %327, %341 : vector<16x32xf32>
    %cst_121 = arith.constant 9.99999993E-9 : f32
    %343 = vector.broadcast %cst_121 : f32 to vector<16x1xf32>
    %344 = arith.addf %340, %343 : vector<16x1xf32>
    %345 = math.rsqrt %344 : vector<16x1xf32>
    %346 = vector.broadcast %345 : vector<16x1xf32> to vector<16x32xf32>
    %347 = arith.mulf %342, %346 : vector<16x32xf32>
    %348 = vector.broadcast %328 : vector<1x32xf32> to vector<16x32xf32>
    %349 = arith.mulf %347, %348 : vector<16x32xf32>
    %350 = vector.broadcast %329 : vector<1x32xf32> to vector<16x32xf32>
    %351 = arith.addf %349, %350 : vector<16x32xf32>
    %c0_122 = arith.constant 0 : index
    %c0_123 = arith.constant 0 : index
    %352 = vector.load %arg5[%c0_122, %c0_123] : memref<16x32xf32, #tpu.memory_space<vmem>>, vector<16x32xf32>
    tpu.vector_store %arg5[%c0_122, %c0_123], %351 {strides = array<i32>} : memref<16x32xf32, #tpu.memory_space<vmem>>, vector<16x32xf32>,
    return
  }
  func.func @transform_0(%arg0: i32) -> (i32, i32) {
    %c0_i32 = arith.constant 0 : i32
    %c0_i32_0 = arith.constant 0 : i32
    %c0_i32_1 = arith.constant 0 : i32
    return %c0_i32, %c0_i32_0 : i32, i32
  }
  func.func @transform_1(%arg0: i32) -> (i32, i32) {
    %c0_i32 = arith.constant 0 : i32
    %c0_i32_0 = arith.constant 0 : i32
    %c0_i32_1 = arith.constant 0 : i32
    return %c0_i32, %c0_i32_0 : i32, i32
  }
  func.func @transform_2(%arg0: i32) -> (i32, i32) {
    %c0_i32 = arith.constant 0 : i32
    %c0_i32_0 = arith.constant 0 : i32
    %c0_i32_1 = arith.constant 0 : i32
    return %c0_i32, %c0_i32_0 : i32, i32
  }
  func.func @transform_3(%arg0: i32) -> (i32, i32, i32) {
    %c0_i32 = arith.constant 0 : i32
    %c0_i32_0 = arith.constant 0 : i32
    %c0_i32_1 = arith.constant 0 : i32
    %c0_i32_2 = arith.constant 0 : i32
    return %c0_i32, %c0_i32_0, %c0_i32_1 : i32, i32, i32
  }
  func.func @transform_4(%arg0: i32) -> (i32, i32) {
    %c0_i32 = arith.constant 0 : i32
    %c0_i32_0 = arith.constant 0 : i32
    %c0_i32_1 = arith.constant 0 : i32
    return %c0_i32, %c0_i32_0 : i32, i32
  }
}

</mosaic_0001>

<bundles_post_ra>
// kernel: unisrec_forward.1
= control target key start
LH: loop header
LB: loop body
LE: loop exit
PB: predicated region body
PF: predicated region fallthrough
CT: control target
= control target key end

     0   :  { %v3347_v2 = vmov 0   ;;  %s3894_s0 = inlined_call_operand.vmem [shape: s32[16,2], index: 0, kind: input, shape index: {}]   ;;  %s3895_s1 = inlined_call_operand.vmem [shape: f32[320,32], index: 1, kind: input, shape index: {}]   ;;  %s3896_s2 = inlined_call_operand.vmem [shape: f32[80,256], index: 2, kind: input, shape index: {}]   ;;  %s3897_s3 = inlined_call_operand.vmem [shape: f32[2,40,96], index: 3, kind: input, shape index: {}]   ;;  %s3898_s4 = inlined_call_operand.hbm [shape: f32[16,32], index: 4, kind: output, shape index: {}]  }
   0x1   :  { %v3387_v0 = vld [vmem:[%s3894_s0] sm:$0xff]  ;;  %3207 = vset.pattern.permute.xlu0 %v3347_v2  ;;  %v21_v3 = vld [vmem:[%s3895_s1 + $0x8] sm:$0xff]  ;;  %v22_v4 = vld [vmem:[%s3895_s1 + $0x10] sm:$0xff] }
   0x2   :  { %v20_v1 = vld [vmem:[%s3895_s1] sm:$0xff]  ;;  %v23_v5 = vld [vmem:[%s3895_s1 + $0x18] sm:$0xff]  ;;  %32 = vperm.xlu0 %3207, %v3387_v0  }
   0x3   :  { %v3043_v6 = vpack.c.bf16 %v21_v3, %v20_v1  ;;  %v3047_v7 = vpack.c.bf16 %v23_v5, %v22_v4 }
   0x4   :  { %9 = vsyncpa [#allocation4], 0  ;;  %v3405_v8 = vld [vmem:[%s3894_s0 + $0x8] sm:$0xff]  ;;  %v24_v9 = vld [vmem:[%s3895_s1 + $0x20] sm:$0xff]  ;;  %v3348_v12 = vmov 1   ;;  %v29_v20 = vlaneseq  ;;  %vm55_vm0 = vcmask 457728  }
   0x5   :  { %v25_v10 = vld [vmem:[%s3895_s1 + $0x28] sm:$0xff]  ;;  %3044 = vmatprep.subr.bf16.mxu0 %v3043_v6  ;;  %3208 = vset.pattern.permute.xlu1 %v3348_v12  ;;  %v27_v13 = vld [vmem:[%s3895_s1 + $0x38] sm:$0xff]  ;;  %v28_v14 = vld [vmem:[%s3895_s1 + $0x40] sm:$0xff]  ;;  %v3349_v23 = vmov 0.0   ;;  %vm137_vm3 = vcmask 130048   ;;  %vm246_vm6 = vcmask 261120  }
   0x6   :  { %3046 = vmatpush3.bf16.msra.mxu0 %v3043_v6  ;;  %35 = vperm.xlu0 %3207, %v3405_v8   ;;  %v3051_v11 = vpack.c.bf16 %v25_v10, %v24_v9  ;;  %v26_v15 = vld [vmem:[%s3895_s1 + $0x30] sm:$0xff]  ;;  %v3055_v16 = vpack.c.bf16 %v28_v14, %v27_v13  ;;  %v242_v17 = vld [vmem:[%s3895_s1 + $0x48] sm:$0xff]  ;;  %v3432_v21 = vand.u32 127, %v29_v20  ;;  %v244_v29 = vld [vmem:[%s3895_s1 + $0x58] sm:$0xff]  ;;  %vm328_vm7 = vcmask 64512   ;;  %s3350_s15 = smov 96  }
   0x7   :  { %3048 = vmatprep.subr.bf16.mxu0 %v3047_v7  ;;  %44 = vperm.xlu1 %3208, %v3387_v0   ;;  %v243_v18 = vld [vmem:[%s3895_s1 + $0x50] sm:$0xff]  ;;  %v245_v30 = vld [vmem:[%s3895_s1 + $0x60] sm:$0xff]  ;;  %v352_v34 = vld [vmem:[%s3896_s2 + $0x8] sm:$0xff]  ;;  %vm219_vm8 = vcmp.ne.s32.totalorder %v3387_v0, 0  ;;  %vm220_vm9 = vcmp.ne.s32.totalorder %v3405_v8, 0  ;;  %s3352_s16 = smov 112  }
   0x8   :  { %3056 = vmatprep.subr.bf16.mxu1 %v3055_v16  ;;  %v3059_v19 = vpack.c.bf16 %v243_v18, %v242_v17  ;;  %v3063_v32 = vpack.c.bf16 %v245_v30, %v244_v29  ;;  %v354_v35 = vld [vmem:[%s3896_s2 + $0x18] sm:$0xff]  ;;  %v351_v37 = vld [vmem:[%s3896_s2] sm:$0xff]  ;;  %v353_v38 = vld [vmem:[%s3896_s2 + $0x10] sm:$0xff]  ;;  %v2667_v29 = vsel %vm219_vm8, 1.0, %v3349_v23  ;;  %v2668_v30 = vsel %vm220_vm9, 1.0, %v3349_v23  ;;  %s3353_s17 = smov 64  }
   0x9   :  { %3058 = vmatpush3.bf16.msra.mxu1 %v3055_v16  ;;  %v3067_v36 = vpack.c.bf16 %v354_v35, %v352_v34  ;;  %v356_v39 = vld [vmem:[%s3896_s2 + $0x28] sm:$0xff]  ;;  %v358_v40 = vld [vmem:[%s3896_s2 + $0x38] sm:$0xff]  ;;  %v3069_v42 = vpack.c.bf16 %v353_v38, %v351_v37  ;;  %v355_v45 = vld [vmem:[%s3896_s2 + $0x20] sm:$0xff]  ;;  %s3354_s18 = smov 80   ;;  %s3355_s23 = smov 48  }
   0xa   :  { %3050 = vmatpush3.bf16.msra.mxu0 %v3047_v7  ;;  %3060 = vmatprep.subr.bf16.mxu1 %v3059_v19  ;;  %v3071_v44 = vpack.c.bf16 %v358_v40, %v356_v39  ;;  %v357_v46 = vld [vmem:[%s3896_s2 + $0x30] sm:$0xff]  ;;  %v362_v5 = vld [vmem:[%s3896_s2 + $0x58] sm:$0xff]  ;;  %v364_v7 = vld [vmem:[%s3896_s2 + $0x68] sm:$0xff]  ;;  %s3356_s25 = smov [#allocation3]  }
   0xb   :  { %3052 = vmatprep.subr.bf16.mxu0 %v3051_v11  ;;  %47 = vperm.xlu1 %3208, %v3405_v8   ;;  %v3073_v47 = vpack.c.bf16 %v357_v46, %v355_v45  ;;  %v361_v6 = vld [vmem:[%s3896_s2 + $0x50] sm:$0xff]  ;;  %v366_v9 = vld [vmem:[%s3896_s2 + $0x78] sm:$0xff]  ;;  %v363_v13 = vld [vmem:[%s3896_s2 + $0x60] sm:$0xff]  ;;  %s2648_s26 = sshll.u32 %s3356_s25, 4  ;;  %s2649_s26 = int_to_ptr.vmem [resolvable:$true] %s2648_s26 }
   0xc   :  { %v3075_v10 = vpack.c.bf16 %v366_v9, %v364_v7  ;;  %v365_v14 = vld [vmem:[%s3896_s2 + $0x70] sm:$0xff]  ;;  %v370_v16 = vld [vmem:[%s3896_s2 + $0x98] sm:$0xff]  ;;  %v2671_v34 = vld [vmem:[%s3896_s2 + $0x40] ss:$8 sm:$0x3]  ;;  %s3323_s27 = scalar_lea.vmem %s2649_s26, 256  ;;  %p3328_p1 = scmp.lt.s32.totalorder %s2649_s26, %s2649_s26 }
   0xd   :  { %v3077_v18 = vpack.c.bf16 %v365_v14, %v363_v13  ;;  %v657_v7 = vld [vmem:[%s3897_s3 + $0x8] sm:$0xff]  ;;  %vm3607_vm10 = vmpackc.low %vm137_vm3, %vm137_vm3  ;;  %p3324_p0 = scmp.ne.s32.totalorder %s2649_s26, %s3323_s27  ;;  %p3329_p2 = scmp.lt.s32.totalorder %s3323_s27, %s3323_s27 }
   0xe   :  { %3054 = vmatpush3.bf16.msra.mxu0 %v3051_v11 }
   0xf   :  { %2864 = vmatprep.subr.mxu0 %v26_v15  ;;  %3209 = vset.pattern.permute.xlu1 %v3347_v2  ;;  %p3330_p3 = por %p3329_p2, %p3328_p1 }
  0x11   :  { %p3331_p4 = pnand %p3330_p3, %p3324_p0 }
  0x12   :  { %2865 = vmatpush3.msra.mxu0 %v26_v15  ;;  %v368_v15 = vld [vmem:[%s3896_s2 + $0x88] sm:$0xff] }
  0x13   :  { %469 = vmatprep.subr.mxu0 %v362_v5 }
  0x81   :  { %v33_v22 = vpop.permute.xlu0 %32 }
  0x82   :  { %vm37_vm1 = vcmp.eq.s32.totalorder %v3432_v21, %v33_v22  ;;  %v3079_v22 = vpack.c.bf16 %v370_v16, %v368_v15 }
  0x83   :  { %v2659_v24 = vsel %vm37_vm1, 1.0, %v3349_v23 }
  0x84   :  { %2866 = vmatprep.mubr.msk.f32.mxu0 %vm55_vm0, %v2659_v24 }
  0x85   :  { %v36_v25 = vpop.permute.xlu0 %35 }
  0x86   :  { %vm38_vm2 = vcmp.eq.s32.totalorder %v3432_v21, %v36_v25  ;;  %v45_v27 = vpop.permute.xlu1 %44 }
  0x87   :  { %v2660_v26 = vsel %vm38_vm2, 1.0, %v3349_v23  ;;  %vm49_vm4 = vcmp.eq.s32.totalorder %v3432_v21, %v45_v27  ;;  %v369_v27 = vld [vmem:[%s3896_s2 + $0x90] sm:$0xff] }
  0x88   :  { %2867 = vmatmul.mubr.msk.f32.vlgmr.msra.gmra.mrb[0].mxu0 %vm55_vm0, %v2660_v26  ;;  %v2661_v28 = vsel %vm49_vm4, 1.0, %v3349_v23  ;;  %v367_v26 = vld [vmem:[%s3896_s2 + $0x80] sm:$0xff] }
  0x89   :  { %533 = vmatprep.mubr.f32.mxu0 %v3349_v23  ;;  %2873 = vmatprep.mubr.msk.f32.mxu1 %vm137_vm3, %v2661_v28  ;;  %v3081_v28 = vpack.c.bf16 %v369_v27, %v367_v26 }
  0x8a   :  { %v48_v31 = vpop.permute.xlu1 %47  ;;  %470 = vmatpush1.msra.mxu0 %v361_v6  ;;  %v656_v6 = vld [vmem:[%s3897_s3] sm:$0xff] }
  0x8b   :  { %vm50_vm5 = vcmp.eq.s32.totalorder %v3432_v21, %v48_v31  ;;  %3076 = vmatprep.subr.bf16.mxu0 %v3075_v10  ;;  %v3210_v31 = vpack.i.bf16 %v2668_v30, %v2667_v29  ;;  %v3083_v9 = vpack.c.bf16 %v657_v7, %v656_v6  ;;  %v658_v10 = vld [vmem:[%s3897_s3 + $0x10] sm:$0xff] }
  0x8c   :  { %v2662_v33 = vsel %vm50_vm5, 1.0, %v3349_v23 }
  0x8d   :  { %2874 = vmatmul.mubr.msk.f32.vlgmr.msra.gmra.mrb[0].mxu1 %vm137_vm3, %v2662_v33 }
  0x8e   :  { %3062 = vmatpush3.bf16.msra.mxu1 %v3059_v19 }
  0x8f   :  { %3064 = vmatprep.subr.bf16.mxu1 %v3063_v32 }
  0x92   :  { %3066 = vmatpush3.bf16.msra.mxu1 %v3063_v32  ;;  %v3535_v32 = vshrl.u32 %v29_v20, 7 }
  0x93   :  { %3068 = vmatprep.subr.bf16.mxu1 %v3067_v36 }
  0x94   :  { %v3538_v33 = vsub.s32 0, %v3535_v32  ;;  %v455_v0 = vsub.s32 1, %v3535_v32 }
  0x96   :  { %v452_v8 = vrot.slane %v2671_v34, %v3538_v33  ;;  %v456_v35 = vrot.slane %v2671_v34, %v455_v0 }
 0x15b   :  { %v2868_v41 = vpop.f32.mrb[0].mxu0 }
 0x15c   :  { %v128_v43 = vpop.f32.mrb[1].mxu0 }
 0x15d   :  { %2884 = vmatprep.mubr.msk.f32.mxu1 %vm246_vm6, %v128_v43 }
 0x15e   :  { %2885 = vmatmul.mubr.msk.f32.vlgmr.msra.gmra.mrb[2].mxu1 %vm246_vm6, %v2868_v41 }
 0x15f   :  { %3070 = vmatpush1.bf16.msra.mxu1 %v3069_v42  ;;  %435 = vmatprep.mubr.f32.mxu1 %v3349_v23 }
 0x160   :  { %3072 = vmatprep.subr.bf16.mxu1 %v3071_v44  ;;  %v3478_v48 = vpop.f32.mrb[0].mxu1 }
 0x161   :  { %v3480_v49 = vpop.f32.mrb[1].mxu1 }
 0x163   :  { %3074 = vmatpush1.bf16.msra.mxu1 %v3073_v47 }
 0x164   :  { %3084 = vmatprep.subr.bf16.mxu1 %v3083_v9 }
 0x166   :  { %2672 = vmatmul.mubr.msk.f32.vlgmr.msra.gmra.mrb[4].mxu1 %vm246_vm6, %v128_v43 }
 0x167   :  { %441 = vmatprep.mubr.f32.mxu1 %v3349_v23  ;;  %3086 = vmatpush3.bf16.msra.mxu1 %v3083_v9 }
 0x16a   :  { %2673 = vmatmul.mubr.msk.f32.gmra.mrb[6].mxu1 %vm246_vm6, %v2868_v41 }
 0x231   :  { %v2886_v50 = vpop.f32.mrb[2].mxu1 }
 0x232   :  { %v319_v51 = vpop.f32.mrb[3].mxu1  ;;  %v332_v52 = vsel %vm328_vm7, %v2886_v50, -inf }
 0x233   :  { %333 = vmax.xlane.f32.xlu1 %v332_v52  ;;  %v329_v53 = vsel %vm328_vm7, %v319_v51, -inf }
 0x234   :  { %330 = vmax.xlane.f32.xlu0 %v329_v53 }
 0x239   :  { %v3487_v54 = vpop.f32.mrb[4].mxu1 }
 0x23a   :  { %v3489_v55 = vpop.f32.mrb[5].mxu1  ;;  %v459_v36 = vsub.f32 %v3487_v54, %v452_v8 }
 0x23d   :  { %v3491_v56 = vpop.f32.mrb[6].mxu1 }
 0x23e   :  { %v3493_v57 = vpop.f32.mrb[7].mxu1  ;;  %v461_v40 = vsub.f32 %v3491_v56, %v452_v8 }
 0x23f   :  { %v462_v41 = vsub.f32 %v3493_v57, %v456_v35 }
 0x244   :  { %3211 = vperm.xlu1 %3209, %v3210_v31  }
 0x2c0   :  { %v334_v58 = vpop.xlane.xlu1 %333 }
 0x2c1   :  { %v336_v59 = vsub.f32 %v2886_v50, %v334_v58  ;;  %v331_v60 = vpop.xlane.xlu0 %330 }
 0x2c2   :  { %v335_v61 = vsub.f32 %v319_v51, %v331_v60 }
 0x2c3   :  { %v339_v62 = vmul.f32 1.442695, %v336_v59 }
 0x2c4   :  { %v337_v63 = vmul.f32 1.442695, %v335_v61  ;;  %v3212_v46 = vpop.permute.xlu1 %3211 }
 0x2c5   :  { %v3549_v47 = vunpack.i.l.bf16 %v3212_v46 }
 0x2c6   :  { %3255 = vpow2.f32 %v337_v63 }
 0x2c7   :  { %3257 = vpow2.f32 %v339_v62 }
 0x2d0   :  { %v3256_v1 = vpop.eup %3255 }
 0x2d1   :  { %v341_v2 = vsel %vm328_vm7, %v3256_v1, 0.0  ;;  %v3258_v3 = vpop.eup %3257 }
 0x2d2   :  { %342 = vadd.xlane.f32.xlu0 %v341_v2  ;;  %v344_v4 = vsel %vm328_vm7, %v3258_v3, 0.0 }
 0x2d6   :  { %345 = vadd.xlane.f32.xlu0 %v344_v4 }
 0x35f   :  { %v343_v11 = vpop.xlane.xlu0 %342 }
 0x360   :  { %3259 = vrcp.f32 %v343_v11  ;;  %v659_v11 = vld [vmem:[%s3897_s3 + $0x18] sm:$0xff] }
 0x363   :  { %v346_v12 = vpop.xlane.xlu0 %345 }
 0x364   :  { %3261 = vrcp.f32 %v346_v12  ;;  %v3087_v12 = vpack.c.bf16 %v659_v11, %v658_v10 }
 0x366   :  { %3088 = vmatprep.subr.bf16.mxu1 %v3087_v12 }
 0x367   :  { %3090 = vmatpush3.bf16.msra.mxu1 %v3087_v12 }
 0x36a   :  { %v3260_v17 = vpop.eup %3259 }
 0x36b   :  { %v349_v19 = vmul.f32 %v3260_v17, %v3256_v1 }
 0x36d   :  { %2674 = vmatmul.mubr.msk.f32.vlgmr.msra.gmra.mrb[2].mxu0 %vm328_vm7, %v349_v19 }
 0x36e   :  { %v3262_v24 = vpop.eup %3261  ;;  %539 = vmatprep.mubr.f32.mxu0 %v3349_v23  ;;  %3078 = vmatpush1.bf16.xpose.msra.mxu0 %v3077_v18  ;;  %v460_v23 = vsub.f32 %v3489_v55, %v456_v35  ;;  %v3553_v55 = vunpack.i.h.bf16 %v3212_v46 }
 0x36f   :  { %v350_v25 = vmul.f32 %v3262_v24, %v3258_v3  ;;  %3080 = vmatprep.subr.bf16.mxu0 %v3079_v22  ;;  %v2676_v22 = vld [vmem:[%s3895_s1 + $0x70] ss:$0 sm:$0xff] }
 0x371   :  { %2675 = vmatmul.mubr.msk.f32.gmra.mrb[4].mxu0 %vm328_vm7, %v350_v25  ;;  %v2677_v25 = vld [vmem:[%s3895_s1 + $0x71] ss:$0 sm:$0xff] }
 0x376   :  { %3082 = vmatpush1.bf16.xpose.msra.mxu0 %v3081_v28 }
 0x440   :  { %v535_v37 = vpop.f32.mrb[2].mxu0 }
 0x441   :  { %v546_v38 = vmul.f32 %v535_v37, %v459_v36  ;;  %v537_v20 = vpop.f32.mrb[3].mxu0  ;;  %v660_v36 = vld [vmem:[%s3897_s3 + $0x20] sm:$0xff] }
 0x442   :  { %v547_v39 = vmul.f32 %v537_v20, %v460_v23  ;;  %v711_v23 = vrot.slane %v660_v36, %v3538_v33 }
 0x444   :  { %v541_v42 = vpop.f32.mrb[4].mxu0  ;;  %614 = vmatprep.mubr.f32.mxu0 %v547_v39 }
 0x445   :  { %v548_v43 = vmul.f32 %v541_v42, %v461_v40  ;;  %v543_v44 = vpop.f32.mrb[5].mxu0  ;;  %615 = vmatmul.mubr.f32.vlgmr.msra.gmra.mrb[6].mxu0 %v546_v38 }
 0x446   :  { %v549_v45 = vmul.f32 %v543_v44, %v462_v41 }
 0x448   :  { %619 = vmatprep.mubr.f32.mxu0 %v549_v45 }
 0x449   :  { %620 = vmatmul.mubr.f32.gmra.mrb[8].mxu0 %v548_v43 }
 0x518   :  { %v616_v50 = vpop.f32.mrb[6].mxu0 }
 0x519   :  { %v617_v51 = vadd.f32 %v616_v50, %v3480_v49  ;;  %v618_v52 = vpop.f32.mrb[7].mxu0 }
 0x51b   :  { %v635_v53 = vmul.f32 %v3549_v47, %v617_v51 }
 0x51c   :  { %v621_v54 = vpop.f32.mrb[8].mxu0 }
 0x51d   :  { %v622_v56 = vadd.f32 %v3478_v48, %v621_v54  ;;  %v623_v57 = vpop.f32.mrb[9].mxu0  ;;  %v661_v58 = vsel %vm246_vm6, %v635_v53, 0.0  ;;  %702 = vst.msk [vmem:[#allocation2 + $0x10] sm:$0xff] %vm246_vm6, %v635_v53 }
 0x51e   :  { %662 = vadd.xlane.f32.xlu0 %v661_v58  ;;  %v233_v57 = vand.u32 7, %v3432_v21 }
 0x51f   :  { %v636_v59 = vmul.f32 %v3553_v55, %v622_v56  ;;  %v230_v56 = vshra.s32 %v3432_v21, 3 }
 0x521   :  { %703 = vst.msk [vmem:[#allocation2 + $0x18] sm:$0xff] %vm246_vm6, %v636_v59  ;;  %v664_v49 = vsel %vm246_vm6, %v636_v59, 0.0 }
 0x522   :  { %665 = vadd.xlane.f32.xlu0 %v664_v49  ;;  %v234_v49 = vand.u32 7, %v3535_v32 }
 0x524   :  { %v706_v8 = vld [vmem:[#allocation2 + $0x10] sm:$0xff]  ;;  %vm236_vm14 = vcmp.le.s32.totalorder %v233_v57, %v234_v49 }
 0x528   :  { %v707_v35 = vld [vmem:[#allocation2 + $0x18] sm:$0xff] }
 0x5ab   :  { %v663_v60 = vpop.xlane.xlu0 %662 }
 0x5ac   :  { %v668_v61 = vmul.f32 0.03125, %v663_v60 }
 0x5ae   :  { %v670_v62 = vsub.f32 %v635_v53, %v668_v61  ;;  %v227_v53 = vadd.s32 8, %v3535_v32  ;;  %v3351_v61 = vmov -1e+30  }
 0x5af   :  { %v666_v63 = vpop.xlane.xlu0 %665 }
 0x5b0   :  { %v669_v1 = vmul.f32 0.03125, %v666_v63  ;;  %v672_v2 = vmul.f32 %v670_v62, %v670_v62  ;;  %v229_v54 = vshra.s32 %v227_v53, 3  ;;  %v235_v58 = vand.u32 7, %v227_v53 }
 0x5b2   :  { %v671_v48 = vsub.f32 %v636_v59, %v669_v1  ;;  %v674_v3 = vsel %vm246_vm6, %v672_v2, 0.0  ;;  %v228_v59 = vshra.s32 %v3535_v32, 3  ;;  %vm232_vm11 = vcmp.eq.s32.totalorder %v229_v54, %v230_v56 }
 0x5b3   :  { %675 = vadd.xlane.f32.xlu0 %v674_v3  ;;  %vm237_vm12 = vcmp.le.s32.totalorder %v233_v57, %v235_v58 }
 0x5b4   :  { %v673_v4 = vmul.f32 %v671_v48, %v671_v48  ;;  %vm231_vm13 = vcmp.eq.s32.totalorder %v228_v59, %v230_v56  ;;  %vm239_vm15 = vmand %vm232_vm11, %vm237_vm12 }
 0x5b5   :  { %vm238_vm0 = vmand %vm231_vm13, %vm236_vm14 }
 0x5b6   :  { %v677_v5 = vsel %vm246_vm6, %v673_v4, 0.0  ;;  %v3623_v2 = vsel %vm238_vm0, 0.0, %v3351_v61 }
 0x5b7   :  { %678 = vadd.xlane.f32.xlu0 %v677_v5 }
 0x640   :  { %v676_v13 = vpop.xlane.xlu0 %675 }
 0x641   :  { %v680_v14 = vmul.f32 0.03125, %v676_v13 }
 0x643   :  { %v682_v15 = vadd.f32 1e-08, %v680_v14 }
 0x644   :  { %v679_v16 = vpop.xlane.xlu0 %678 }
 0x645   :  { %3263 = vrsqrt.f32 %v682_v15  ;;  %v681_v17 = vmul.f32 0.03125, %v679_v16 }
 0x647   :  { %v683_v18 = vadd.f32 1e-08, %v681_v17 }
 0x649   :  { %3265 = vrsqrt.f32 %v683_v18 }
 0x64f   :  { %v3264_v19 = vpop.eup %3263 }
 0x650   :  { %v686_v24 = vmul.f32 %v3264_v19, %v670_v62  ;;  %v3621_v62 = vsel %vm239_vm15, 0.0, %v3351_v61 }
 0x652   :  { %v692_v26 = vmul.f32 %v2676_v22, %v686_v24  ;;  %v645_v24 = vld [vmem:[%s3895_s1 + $0x80] sm:$0xff] }
 0x653   :  { %v3266_v27 = vpop.eup %3265 }
 0x654   :  { %v3581_v28 = vadd.f32 %v2677_v25, %v692_v26  ;;  %v687_v29 = vmul.f32 %v3266_v27, %v671_v48 }
 0x656   :  { %700 = vst.msk [vmem:[#allocation2] sm:$0xff] %vm246_vm6, %v3581_v28  ;;  %v693_v30 = vmul.f32 %v2676_v22, %v687_v29  ;;  %v644_v22 = vld [vmem:[%s3895_s1 + $0x78] sm:$0xff] }
 0x658   :  { %v3585_v31 = vadd.f32 %v2677_v25, %v693_v30  ;;  %v3101_v25 = vpack.c.bf16 %v645_v24, %v644_v22 }
 0x65a   :  { %701 = vst.msk [vmem:[#allocation2 + $0x8] sm:$0xff] %vm246_vm6, %v3585_v31  ;;  %3102 = vmatprep.subr.bf16.mxu0 %v3101_v25 }
 0x65b   :  { %3104 = vmatpush3.bf16.msra.mxu0 %v3101_v25 }
 0x65d   :  { %v704_v34 = vld [vmem:[#allocation2] sm:$0xff] }
 0x65e   :  { %2895 = vmatprep.mubr.msk.f32.mxu1 %vm246_vm6, %v704_v34 }
 0x661   :  { %v705_v0 = vld [vmem:[#allocation2 + $0x8] sm:$0xff] }
 0x662   :  { %2896 = vmatmul.mubr.msk.f32.vlgmr.msra.gmra.mrb[8].mxu1 %vm246_vm6, %v705_v0 }
 0x663   :  { %2898 = vmatprep.mubr.msk.f32.mxu1 %vm246_vm6, %v706_v8 }
 0x666   :  { %2899 = vmatmul.mubr.msk.f32.gmra.mrb[10].mxu1 %vm246_vm6, %v707_v35 }
 0x735   :  { %v2897_v37 = vpop.f32.mrb[8].mxu1 }
 0x736   :  { %v796_v38 = vadd.f32 %v2897_v37, %v711_v23  ;;  %v790_v20 = vpop.f32.mrb[9].mxu1 }
 0x737   :  { %v3597_v39 = vadd.f32 %v790_v20, %v711_v23 }
 0x739   :  { %v2900_v40 = vpop.f32.mrb[10].mxu1  ;;  %2905 = vmatprep.mubr.msk.f32.mxu1 %vm137_vm3, %v3597_v39 }
 0x73a   :  { %v806_v41 = vadd.f32 %v2900_v40, %v711_v23  ;;  %v800_v42 = vpop.f32.mrb[11].mxu1 }
 0x73b   :  { %v801_v43 = vadd.f32 %v800_v42, %v711_v23 }
 0x73d   :  { %v3601_v44 = vpack.i.bf16 %v806_v41, %v801_v43 }
 0x73f   :  { %3216 = vrot.lane.b32.xlu1 %v3601_v44, %s3350_s15 }
 0x7b1   :  { %v3217_v45 = vpop.permute.xlu1 %3216 }
 0x7b2   :  { %v3219_v46 = vunpack.i.h.bf16 %v3217_v45  ;;  %v3218_v50 = vunpack.i.l.bf16 %v3217_v45 }
 0x7b4   :  { %v3091_v52 = vpack.c.bf16 %v3219_v46, %v3218_v50 }
 0x7b6   :  { %3093 = vmatprep.subr.msk.bf16.mxu1 %vm3607_vm10, %v3091_v52 }
 0x7b7   :  { %3096 = vmatpush3.bf16.xpose.msk.msra.mxu1 %vm3607_vm10, %v3091_v52 }
 0x7be   :  { %2906 = vmatmul.mubr.msk.f32.vlgmr.msra.gmra.mrb[12].mxu1 %vm137_vm3, %v796_v38 }
 0x891   :  { %v2907_v60 = vpop.f32.mrb[12].mxu1 }
 0x892   :  { %v901_v63 = vmul.f32 0.25, %v2907_v60  ;;  %v891_v1 = vpop.f32.mrb[13].mxu1 }
 0x893   :  { %v900_v21 = vmul.f32 0.25, %v891_v1 }
 0x894   :  { %v903_v48 = vadd.f32 %v901_v63, %v3621_v62 }
 0x895   :  { %v902_v3 = vadd.f32 %v900_v21, %v3623_v2 }
 0x896   :  { %v907_v32 = vsel %vm137_vm3, %v903_v48, -inf }
 0x897   :  { %908 = vmax.xlane.f32.xlu1 %v907_v32  ;;  %v904_v4 = vsel %vm137_vm3, %v902_v3, -inf  ;;  %v647_v32 = vld [vmem:[%s3895_s1 + $0x90] sm:$0xff] }
 0x898   :  { %905 = vmax.xlane.f32.xlu0 %v904_v4 }
 0x8a8   :  { %1102 = vrot.lane.b32.xlu1 %v796_v38, %s3352_s16 }
 0x8ae   :  { %3221 = vrot.lane.b32.xlu0 %v3601_v44, %s3353_s17 }
 0x924   :  { %v909_v5 = vpop.xlane.xlu1 %908 }
 0x925   :  { %v911_v6 = vsub.f32 %v903_v48, %v909_v5  ;;  %v906_v7 = vpop.xlane.xlu0 %905 }
 0x926   :  { %v910_v9 = vsub.f32 %v902_v3, %v906_v7  ;;  %v646_v3 = vld [vmem:[%s3895_s1 + $0x88] sm:$0xff] }
 0x927   :  { %v914_v10 = vmul.f32 1.442695, %v911_v6  ;;  %v3115_v7 = vpack.c.bf16 %v647_v32, %v646_v3  ;;  %v2701_v32 = vld [vmem:[%s3895_s1 + $0x75] ss:$0 sm:$0xff] }
 0x928   :  { %v912_v11 = vmul.f32 1.442695, %v910_v9  ;;  %v1103_v38 = vpop.permute.xlu1 %1102 }
 0x929   :  { %3267 = vpow2.f32 %v914_v10  ;;  %v3222_v12 = vpop.permute.xlu0 %3221 }
 0x92a   :  { %v3224_v13 = vunpack.i.h.bf16 %v3222_v12  ;;  %v3223_v14 = vunpack.i.l.bf16 %v3222_v12  ;;  %3269 = vpow2.f32 %v912_v11 }
 0x92c   :  { %v3097_v15 = vpack.c.bf16 %v3224_v13, %v3223_v14  ;;  %v2690_v14 = vld [vmem:[%s3895_s1 + $0x74] ss:$0 sm:$0xff] }
 0x92e   :  { %3098 = vmatprep.subr.bf16.mxu1 %v3097_v15 }
 0x92f   :  { %3100 = vmatpush3.bf16.msra.mxu1 %v3097_v15 }
 0x933   :  { %v3268_v16 = vpop.eup %3267 }
 0x934   :  { %v919_v17 = vsel %vm137_vm3, %v3268_v16, 0.0  ;;  %v3270_v18 = vpop.eup %3269 }
 0x935   :  { %920 = vadd.xlane.f32.xlu0 %v919_v17  ;;  %v916_v19 = vsel %vm137_vm3, %v3270_v18, 0.0 }
 0x939   :  { %917 = vadd.xlane.f32.xlu0 %v916_v19 }
 0x94f   :  { %3226 = vrot.lane.b32.xlu0 %v3601_v44, %s3354_s18 }
 0x953   :  { %1100 = vrot.lane.b32.xlu0 %v3597_v39, %s3352_s16 }
 0x9c2   :  { %v921_v26 = vpop.xlane.xlu0 %920 }
 0x9c3   :  { %3271 = vrcp.f32 %v921_v26 }
 0x9c6   :  { %v918_v27 = vpop.xlane.xlu0 %917 }
 0x9c7   :  { %3273 = vrcp.f32 %v918_v27 }
 0x9ca   :  { %v3227_v29 = vpop.permute.xlu0 %3226 }
 0x9cb   :  { %v3229_v30 = vunpack.i.h.bf16 %v3227_v29  ;;  %v3228_v34 = vunpack.i.l.bf16 %v3227_v29 }
 0x9cd   :  { %v3105_v0 = vpack.c.bf16 %v3229_v30, %v3228_v34  ;;  %v3272_v8 = vpop.eup %3271 }
 0x9ce   :  { %v925_v23 = vmul.f32 %v3272_v8, %v3268_v16  ;;  %v1101_v37 = vpop.permute.xlu0 %1100 }
 0x9cf   :  { %3107 = vmatprep.subr.msk.bf16.mxu1 %vm3607_vm10, %v3105_v0 }
 0x9d1   :  { %v3274_v35 = vpop.eup %3273 }
 0x9d2   :  { %v924_v36 = vmul.f32 %v3274_v35, %v3270_v18 }
 0x9d4   :  { %2912 = vmatprep.mubr.msk.f32.mxu1 %vm137_vm3, %v924_v36 }
 0x9d5   :  { %2913 = vmatmul.mubr.msk.f32.vlgmr.msra.gmra.mrb[14].mxu1 %vm137_vm3, %v925_v23  ;;  %v649_v23 = vld [vmem:[%s3895_s1 + $0xa0] sm:$0xff] }
 0x9d6   :  { %3110 = vmatpush3.bf16.xpose.msk.msra.mxu1 %vm3607_vm10, %v3105_v0  ;;  %2926 = vmatprep.mubr.msk.f32.mxu1 %vm137_vm3, %v1101_v37 }
 0x9dd   :  { %2927 = vmatmul.mubr.msk.f32.vlgmr.msra.gmra.mrb[16].mxu1 %vm137_vm3, %v1103_v38  ;;  %v650_v38 = vld [vmem:[%s3895_s1 + $0xa8] sm:$0xff] }
 0xaa8   :  { %v2914_v20 = vpop.f32.mrb[14].mxu1 }
 0xaa9   :  { %v1004_v39 = vpop.f32.mrb[15].mxu1 }
 0xaaa   :  { %2919 = vmatprep.mubr.msk.f32.mxu0 %vm137_vm3, %v1004_v39 }
 0xaab   :  { %2920 = vmatmul.mubr.msk.f32.vlgmr.msra.gmra.mrb[10].mxu0 %vm137_vm3, %v2914_v20  ;;  %v651_v20 = vld [vmem:[%s3895_s1 + $0xb0] sm:$0xff] }
 0xaac   :  { %v3123_v39 = vpack.c.bf16 %v651_v20, %v650_v38 }
 0xab0   :  { %v2928_v40 = vpop.f32.mrb[16].mxu1 }
 0xab1   :  { %v1192_v41 = vmul.f32 0.25, %v2928_v40  ;;  %v1182_v42 = vpop.f32.mrb[17].mxu1 }
 0xab2   :  { %v1191_v43 = vmul.f32 0.25, %v1182_v42 }
 0xab3   :  { %v1194_v45 = vadd.f32 %v1192_v41, %v3621_v62 }
 0xab4   :  { %v1193_v46 = vadd.f32 %v1191_v43, %v3623_v2 }
 0xab5   :  { %v1198_v50 = vsel %vm137_vm3, %v1194_v45, -inf }
 0xab6   :  { %1199 = vmax.xlane.f32.xlu1 %v1198_v50  ;;  %v1195_v52 = vsel %vm137_vm3, %v1193_v46, -inf }
 0xab7   :  { %1196 = vmax.xlane.f32.xlu0 %v1195_v52  ;;  %v2699_v52 = vld [vmem:[%s3895_s1 + $0x72] ss:$0 sm:$0xff] }
 0xb43   :  { %v1200_v53 = vpop.xlane.xlu1 %1199 }
 0xb44   :  { %v1202_v54 = vsub.f32 %v1194_v45, %v1200_v53  ;;  %v1197_v56 = vpop.xlane.xlu0 %1196 }
 0xb45   :  { %v1201_v57 = vsub.f32 %v1193_v46, %v1197_v56 }
 0xb46   :  { %v1205_v58 = vmul.f32 1.442695, %v1202_v54  ;;  %v2700_v54 = vld [vmem:[%s3895_s1 + $0x73] ss:$0 sm:$0xff] }
 0xb47   :  { %v1203_v59 = vmul.f32 1.442695, %v1201_v57 }
 0xb48   :  { %3275 = vpow2.f32 %v1205_v58 }
 0xb49   :  { %3277 = vpow2.f32 %v1203_v59 }
 0xb52   :  { %v3276_v49 = vpop.eup %3275 }
 0xb53   :  { %v1210_v60 = vsel %vm137_vm3, %v3276_v49, 0.0  ;;  %v3278_v61 = vpop.eup %3277 }
 0xb54   :  { %1211 = vadd.xlane.f32.xlu0 %v1210_v60  ;;  %v1207_v63 = vsel %vm137_vm3, %v3278_v61, 0.0 }
 0xb58   :  { %1208 = vadd.xlane.f32.xlu0 %v1207_v63  ;;  %v653_v63 = vld [vmem:[%s3895_s1 + $0xc0] sm:$0xff] }
 0xb6e   :  { %3231 = vrot.lane.b32.xlu0 %v3601_v44, %s3355_s23 }
 0xbe1   :  { %v1212_v1 = vpop.xlane.xlu0 %1211 }
 0xbe2   :  { %3279 = vrcp.f32 %v1212_v1 }
 0xbe5   :  { %v1209_v21 = vpop.xlane.xlu0 %1208 }
 0xbe6   :  { %3281 = vrcp.f32 %v1209_v21  ;;  %v654_v21 = vld [vmem:[%s3895_s1 + $0xc8] sm:$0xff] }
 0xbe9   :  { %v3232_v48 = vpop.permute.xlu0 %3231 }
 0xbea   :  { %v3234_v4 = vunpack.i.h.bf16 %v3232_v48  ;;  %v3233_v5 = vunpack.i.l.bf16 %v3232_v48  ;;  %v655_v48 = vld [vmem:[%s3895_s1 + $0xd0] sm:$0xff] }
 0xbeb   :  { %v3131_v3 = vpack.c.bf16 %v655_v48, %v654_v21 }
 0xbec   :  { %v3111_v6 = vpack.c.bf16 %v3234_v4, %v3233_v5  ;;  %v3280_v9 = vpop.eup %3279 }
 0xbed   :  { %v1216_v11 = vmul.f32 %v3280_v9, %v3276_v49 }
 0xbee   :  { %3112 = vmatprep.subr.bf16.mxu0 %v3111_v6 }
 0xbef   :  { %3114 = vmatpush3.bf16.msra.mxu0 %v3111_v6 }
 0xbf0   :  { %v3282_v44 = vpop.eup %3281  ;;  %3116 = vmatprep.subr.bf16.mxu0 %v3115_v7 }
 0xbf1   :  { %v1215_v10 = vmul.f32 %v3282_v44, %v3278_v61  ;;  %v652_v61 = vld [vmem:[%s3895_s1 + $0xb8] sm:$0xff] }
 0xbf2   :  { %v3127_v1 = vpack.c.bf16 %v653_v63, %v652_v61 }
 0xbf3   :  { %2933 = vmatprep.mubr.msk.f32.mxu0 %vm137_vm3, %v1215_v10 }
 0xbf4   :  { %2934 = vmatmul.mubr.msk.f32.vlgmr.msra.gmra.mrb[12].mxu0 %vm137_vm3, %v1216_v11 }
 0xbf5   :  { %3118 = vmatpush3.bf16.msra.mxu0 %v3115_v7 }
 0xbf6   :  { %3128 = vmatprep.subr.bf16.mxu0 %v3127_v1 }
 0xcc7   :  { %v2935_v12 = vpop.f32.mrb[12].mxu0 }
 0xcc8   :  { %v1295_v13 = vpop.f32.mrb[13].mxu0 }
 0xcc9   :  { %2940 = vmatprep.mubr.msk.f32.mxu0 %vm137_vm3, %v1295_v13 }
 0xcca   :  { %2941 = vmatmul.mubr.msk.f32.vlgmr.msra.gmra.mrb[10].mxu0 %vm137_vm3, %v2935_v12 }
 0xccb   :  { %3130 = vmatpush3.bf16.msra.mxu0 %v3127_v1 }
 0xccc   :  { %3132 = vmatprep.subr.bf16.mxu0 %v3131_v3 }
 0xccf   :  { %3134 = vmatpush3.bf16.msra.mxu0 %v3131_v3  ;;  %v2712_v3 = vld [vmem:[%s3895_s1 + $0xd8] ss:$0 sm:$0xff] }
 0xd9d   :  { %v2942_v15 = vpop.f32.mrb[10].mxu0 }
 0xd9e   :  { %v1376_v16 = vpop.f32.mrb[11].mxu0  ;;  %v3187_v17 = vadd.f32 %v2942_v15, %v2690_v14 }
 0xd9f   :  { %v3188_v18 = vadd.f32 %v2690_v14, %v1376_v16 }
 0xda0   :  { %v1388_v24 = vadd.f32 %v3187_v17, %v3585_v31  ;;  %v648_v31 = vld [vmem:[%s3895_s1 + $0x98] sm:$0xff] }
 0xda1   :  { %v1387_v19 = vadd.f32 %v3188_v18, %v3581_v28  ;;  %v3119_v37 = vpack.c.bf16 %v649_v23, %v648_v31 }
 0xda2   :  { %v1392_v25 = vsel %vm246_vm6, %v1388_v24, 0.0 }
 0xda3   :  { %v1389_v22 = vsel %vm246_vm6, %v1387_v19, 0.0  ;;  %3120 = vmatprep.subr.bf16.mxu1 %v3119_v37 }
 0xda4   :  { %1390 = vadd.xlane.f32.xlu1 %v1389_v22  ;;  %3122 = vmatpush3.bf16.msra.mxu1 %v3119_v37 }
 0xda5   :  { %3124 = vmatprep.subr.bf16.mxu1 %v3123_v39 }
 0xda8   :  { %1393 = vadd.xlane.f32.xlu1 %v1392_v25  ;;  %3126 = vmatpush3.bf16.msra.mxu1 %v3123_v39 }
 0xe31   :  { %v1391_v26 = vpop.xlane.xlu1 %1390 }
 0xe32   :  { %v1395_v27 = vmul.f32 0.03125, %v1391_v26 }
 0xe34   :  { %v1397_v29 = vsub.f32 %v1387_v19, %v1395_v27 }
 0xe35   :  { %v1394_v30 = vpop.xlane.xlu1 %1393 }
 0xe36   :  { %v1396_v34 = vmul.f32 0.03125, %v1394_v30  ;;  %v1399_v0 = vmul.f32 %v1397_v29, %v1397_v29  ;;  %v2704_v30 = vld [vmem:[%s3895_s1 + $0x76] ss:$0 sm:$0xff] }
 0xe38   :  { %v1398_v8 = vsub.f32 %v1388_v24, %v1396_v34  ;;  %v1401_v35 = vsel %vm246_vm6, %v1399_v0, 0.0 }
 0xe39   :  { %1402 = vadd.xlane.f32.xlu1 %v1401_v35 }
 0xe3a   :  { %v1400_v36 = vmul.f32 %v1398_v8, %v1398_v8 }
 0xe3c   :  { %v1404_v28 = vsel %vm246_vm6, %v1400_v36, 0.0 }
 0xe3d   :  { %1405 = vadd.xlane.f32.xlu0 %v1404_v28 }
 0xec6   :  { %v1403_v40 = vpop.xlane.xlu1 %1402 }
 0xec7   :  { %v1407_v41 = vmul.f32 0.03125, %v1403_v40 }
 0xec9   :  { %v1409_v42 = vadd.f32 1e-08, %v1407_v41 }
 0xeca   :  { %v1406_v43 = vpop.xlane.xlu0 %1405 }
 0xecb   :  { %3283 = vrsqrt.f32 %v1409_v42  ;;  %v1408_v45 = vmul.f32 0.03125, %v1406_v43 }
 0xecd   :  { %v1410_v46 = vadd.f32 1e-08, %v1408_v45 }
 0xecf   :  { %3285 = vrsqrt.f32 %v1410_v46 }
 0xed5   :  { %v3284_v50 = vpop.eup %3283 }
 0xed6   :  { %v1413_v53 = vmul.f32 %v3284_v50, %v1397_v29 }
 0xed8   :  { %v1419_v56 = vmul.f32 %v2699_v52, %v1413_v53  ;;  %v2707_v53 = vld [vmem:[%s3897_s3 + $0x28] sm:$0xff] }
 0xed9   :  { %v3286_v57 = vpop.eup %3285 }
 0xeda   :  { %v1414_v58 = vmul.f32 %v3286_v57, %v1398_v8  ;;  %v1425_v59 = vadd.f32 %v2700_v54, %v1419_v56  ;;  %v2709_v57 = vld [vmem:[%s3897_s3 + $0x38] sm:$0xff] }
 0xedc   :  { %v1420_v49 = vmul.f32 %v2699_v52, %v1414_v58  ;;  %2951 = vmatprep.mubr.msk.f32.mxu1 %vm246_vm6, %v1425_v59  ;;  %v2710_v58 = vld [vmem:[%s3897_s3 + $0x40] sm:$0xff] }
 0xede   :  { %v1426_v60 = vadd.f32 %v2700_v54, %v1420_v49  ;;  %v2708_v54 = vld [vmem:[%s3897_s3 + $0x30] sm:$0xff] }
 0xedf   :  { %v3135_v56 = vpack.c.bf16 %v2708_v54, %v2707_v53 }
 0xee0   :  { %2952 = vmatmul.mubr.msk.f32.vlgmr.msra.gmra.mrb[18].mxu1 %vm246_vm6, %v1426_v60 }
 0xee1   :  { %3136 = vmatprep.subr.bf16.mxu1 %v3135_v56 }
 0xee2   :  { %3138 = vmatpush3.bf16.msra.mxu1 %v3135_v56 }
 0xfb3   :  { %v2953_v4 = vpop.f32.mrb[18].mxu1 }
 0xfb4   :  { %v1509_v5 = vadd.f32 %v2953_v4, %v2701_v32  ;;  %v1503_v6 = vpop.f32.mrb[19].mxu1  ;;  %v2713_v4 = vld [vmem:[%s3895_s1 + $0xd9] ss:$0 sm:$0xff] }
 0xfb5   :  { %v1504_v7 = vadd.f32 %v2701_v32, %v1503_v6 }
 0xfb6   :  { %v1513_v9 = vmul.f32 %v1509_v5, %v1509_v5 }
 0xfb7   :  { %v1512_v44 = vmul.f32 %v1504_v7, %v1504_v7 }
 0xfb8   :  { %v1515_v10 = vmul.f32 %v1513_v9, %v1509_v5 }
 0xfb9   :  { %v1514_v11 = vmul.f32 %v1512_v44, %v1504_v7 }
 0xfba   :  { %v1517_v12 = vmul.f32 0.044715, %v1515_v10 }
 0xfbb   :  { %v1516_v13 = vmul.f32 0.044715, %v1514_v11 }
 0xfbc   :  { %v1519_v14 = vadd.f32 %v1517_v12, %v1509_v5 }
 0xfbd   :  { %v1518_v15 = vadd.f32 %v1516_v13, %v1504_v7 }
 0xfbe   :  { %v1521_v16 = vmul.f32 0.7978846, %v1519_v14 }
 0xfbf   :  { %v1520_v17 = vmul.f32 0.7978846, %v1518_v15  ;;  %v2711_v15 = vld [vmem:[%s3897_s3 + $0x48] sm:$0xff] }
 0xfc0   :  { %3287 = vtanh.f32 %v1521_v16  ;;  %v1693_v16 = vrot.slane %v2711_v15, %v3538_v33 }
 0xfc1   :  { %3289 = vtanh.f32 %v1520_v17 }
 0xfca   :  { %v3288_v18 = vpop.eup %3287 }
 0xfcb   :  { %v3290_v19 = vpop.eup %3289  ;;  %v1525_v22 = vadd.f32 1.0, %v3288_v18 }
 0xfcc   :  { %v1524_v24 = vadd.f32 1.0, %v3290_v19 }
 0xfcd   :  { %v1527_v25 = vmul.f32 0.5, %v1525_v22 }
 0xfce   :  { %v1526_v26 = vmul.f32 0.5, %v1524_v24 }
 0xfcf   :  { %v1529_v29 = vmul.f32 %v1527_v25, %v1509_v5 }
 0xfd0   :  { %v1528_v27 = vmul.f32 %v1526_v26, %v1504_v7 }
 0xfd2   :  { %2962 = vmatprep.mubr.msk.f32.mxu0 %vm246_vm6, %v1528_v27 }
 0xfd3   :  { %2963 = vmatmul.mubr.msk.f32.vlgmr.msra.gmra.mrb[14].mxu0 %vm246_vm6, %v1529_v29 }
0x10a6   :  { %v2964_v34 = vpop.f32.mrb[14].mxu0 }
0x10a7   :  { %v1612_v0 = vadd.f32 %v2964_v34, %v2704_v30  ;;  %v1606_v8 = vpop.f32.mrb[15].mxu0 }
0x10a8   :  { %v1607_v35 = vadd.f32 %v2704_v30, %v1606_v8 }
0x10a9   :  { %v1616_v36 = vadd.f32 %v1612_v0, %v1426_v60 }
0x10aa   :  { %v1615_v28 = vadd.f32 %v1607_v35, %v1425_v59  ;;  %v3139_v59 = vpack.c.bf16 %v2710_v58, %v2709_v57  ;;  %v1626_v58 = vld [vmem:[%s3895_s1 + $0xe0] sm:$0xff] }
0x10ab   :  { %v1618_v31 = vmul.f32 %v3553_v55, %v1616_v36 }
0x10ac   :  { %v1617_v23 = vmul.f32 %v3549_v47, %v1615_v28  ;;  %3140 = vmatprep.subr.bf16.mxu1 %v3139_v59 }
0x10ad   :  { %1685 = vst.msk [vmem:[#allocation2 + $0x18] sm:$0xff] %vm246_vm6, %v1618_v31  ;;  %v1647_v38 = vsel %vm246_vm6, %v1618_v31, 0.0  ;;  %3142 = vmatpush3.bf16.msra.mxu1 %v3139_v59  ;;  %v1627_v59 = vld [vmem:[%s3895_s1 + $0xe8] sm:$0xff] }
0x10ae   :  { %1684 = vst.msk [vmem:[#allocation2 + $0x10] sm:$0xff] %vm246_vm6, %v1617_v23  ;;  %v1644_v37 = vsel %vm246_vm6, %v1617_v23, 0.0 }
0x10af   :  { %1645 = vadd.xlane.f32.xlu1 %v1644_v37 }
0x10b3   :  { %1648 = vadd.xlane.f32.xlu1 %v1647_v38 }
0x10b4   :  { %v1689_v14 = vld [vmem:[#allocation2 + $0x18] sm:$0xff] }
0x10b5   :  { %v1688_v13 = vld [vmem:[#allocation2 + $0x10] sm:$0xff] }
0x113c   :  { %v1646_v20 = vpop.xlane.xlu1 %1645 }
0x113d   :  { %v1650_v39 = vmul.f32 0.03125, %v1646_v20 }
0x113f   :  { %v1652_v40 = vsub.f32 %v1617_v23, %v1650_v39 }
0x1140   :  { %v1649_v41 = vpop.xlane.xlu1 %1648 }
0x1141   :  { %v1651_v42 = vmul.f32 0.03125, %v1649_v41  ;;  %v1654_v43 = vmul.f32 %v1652_v40, %v1652_v40 }
0x1143   :  { %v1653_v45 = vsub.f32 %v1618_v31, %v1651_v42  ;;  %v1656_v46 = vsel %vm246_vm6, %v1654_v43, 0.0 }
0x1144   :  { %1657 = vadd.xlane.f32.xlu1 %v1656_v46 }
0x1145   :  { %v1655_v50 = vmul.f32 %v1653_v45, %v1653_v45 }
0x1147   :  { %v1659_v52 = vsel %vm246_vm6, %v1655_v50, 0.0 }
0x1148   :  { %1660 = vadd.xlane.f32.xlu1 %v1659_v52 }
0x11d1   :  { %v1658_v49 = vpop.xlane.xlu1 %1657 }
0x11d2   :  { %v1662_v60 = vmul.f32 0.03125, %v1658_v49  ;;  %v3153_v49 = vpack.c.bf16 %v1627_v59, %v1626_v58 }
0x11d4   :  { %v1664_v61 = vadd.f32 1e-08, %v1662_v60  ;;  %3154 = vmatprep.subr.bf16.mxu1 %v3153_v49 }
0x11d5   :  { %v1661_v63 = vpop.xlane.xlu1 %1660 }
0x11d6   :  { %3291 = vrsqrt.f32 %v1664_v61  ;;  %v1663_v1 = vmul.f32 0.03125, %v1661_v63 }
0x11d8   :  { %v1665_v21 = vadd.f32 1e-08, %v1663_v1 }
0x11da   :  { %3293 = vrsqrt.f32 %v1665_v21 }
0x11e0   :  { %v3292_v48 = vpop.eup %3291 }
0x11e1   :  { %v1668_v32 = vmul.f32 %v3292_v48, %v1652_v40 }
0x11e3   :  { %v1674_v5 = vmul.f32 %v2712_v3, %v1668_v32 }
0x11e4   :  { %v3294_v6 = vpop.eup %3293 }
0x11e5   :  { %v3747_v7 = vadd.f32 %v2713_v4, %v1674_v5  ;;  %v1669_v9 = vmul.f32 %v3294_v6, %v1653_v45 }
0x11e7   :  { %1682 = vst.msk [vmem:[#allocation2] sm:$0xff] %vm246_vm6, %v3747_v7  ;;  %v1675_v44 = vmul.f32 %v2712_v3, %v1669_v9 }
0x11e9   :  { %v3751_v10 = vadd.f32 %v2713_v4, %v1675_v44 }
0x11eb   :  { %1683 = vst.msk [vmem:[#allocation2 + $0x8] sm:$0xff] %vm246_vm6, %v3751_v10 }
0x11ee   :  { %v1686_v11 = vld [vmem:[#allocation2] sm:$0xff] }
0x11ef   :  { %2973 = vmatprep.mubr.msk.f32.mxu1 %vm246_vm6, %v1686_v11 }
0x11f2   :  { %v1687_v12 = vld [vmem:[#allocation2 + $0x8] sm:$0xff] }
0x11f3   :  { %2974 = vmatmul.mubr.msk.f32.vlgmr.msra.gmra.mrb[20].mxu1 %vm246_vm6, %v1687_v12 }
0x11f4   :  { %2976 = vmatprep.mubr.msk.f32.mxu1 %vm246_vm6, %v1688_v13  ;;  %3156 = vmatpush3.bf16.msra.mxu1 %v3153_v49 }
0x11f7   :  { %2977 = vmatmul.mubr.msk.f32.gmra.mrb[22].mxu1 %vm246_vm6, %v1689_v14 }
0x12c6   :  { %v2975_v17 = vpop.f32.mrb[20].mxu1 }
0x12c7   :  { %v1778_v18 = vadd.f32 %v2975_v17, %v1693_v16  ;;  %v1772_v19 = vpop.f32.mrb[21].mxu1 }
0x12c8   :  { %v1773_v22 = vadd.f32 %v1772_v19, %v1693_v16 }
0x12ca   :  { %v2978_v24 = vpop.f32.mrb[22].mxu1  ;;  %2983 = vmatprep.mubr.msk.f32.mxu0 %vm137_vm3, %v1773_v22 }
0x12cb   :  { %v1788_v25 = vadd.f32 %v2978_v24, %v1693_v16  ;;  %v1782_v26 = vpop.f32.mrb[23].mxu1 }
0x12cc   :  { %v1783_v27 = vadd.f32 %v1782_v26, %v1693_v16 }
0x12ce   :  { %v3764_v29 = vpack.i.bf16 %v1788_v25, %v1783_v27 }
0x12d0   :  { %3236 = vrot.lane.b32.xlu1 %v3764_v29, %s3350_s15 }
0x1342   :  { %v3237_v30 = vpop.permute.xlu1 %3236 }
0x1343   :  { %v3239_v34 = vunpack.i.h.bf16 %v3237_v30  ;;  %v3238_v0 = vunpack.i.l.bf16 %v3237_v30 }
0x1345   :  { %v3143_v8 = vpack.c.bf16 %v3239_v34, %v3238_v0 }
0x1347   :  { %3145 = vmatprep.subr.msk.bf16.mxu0 %vm3607_vm10, %v3143_v8 }
0x1348   :  { %3148 = vmatpush3.bf16.xpose.msk.msra.mxu0 %vm3607_vm10, %v3143_v8 }
0x134f   :  { %2984 = vmatmul.mubr.msk.f32.vlgmr.msra.gmra.mrb[16].mxu0 %vm137_vm3, %v1778_v18 }
0x1422   :  { %v2985_v33 = vpop.f32.mrb[16].mxu0 }
0x1423   :  { %v1883_v35 = vmul.f32 0.25, %v2985_v33  ;;  %v1873_v36 = vpop.f32.mrb[17].mxu0 }
0x1424   :  { %v1882_v28 = vmul.f32 0.25, %v1873_v36  ;;  %v1629_v36 = vld [vmem:[%s3895_s1 + $0xf8] sm:$0xff] }
0x1425   :  { %v1885_v31 = vadd.f32 %v1883_v35, %v3621_v62  ;;  %v1628_v35 = vld [vmem:[%s3895_s1 + $0xf0] sm:$0xff] }
0x1426   :  { %v1884_v23 = vadd.f32 %v1882_v28, %v3623_v2 }
0x1427   :  { %v1889_v37 = vsel %vm137_vm3, %v1885_v31, -inf }
0x1428   :  { %1890 = vmax.xlane.f32.xlu1 %v1889_v37  ;;  %v1886_v38 = vsel %vm137_vm3, %v1884_v23, -inf  ;;  %v3167_v37 = vpack.c.bf16 %v1629_v36, %v1628_v35 }
0x1429   :  { %1887 = vmax.xlane.f32.xlu0 %v1886_v38 }
0x1439   :  { %2084 = vrot.lane.b32.xlu1 %v1778_v18, %s3352_s16 }
0x143f   :  { %3241 = vrot.lane.b32.xlu0 %v3764_v29, %s3353_s17 }
0x14b5   :  { %v1891_v20 = vpop.xlane.xlu1 %1890 }
0x14b6   :  { %v1893_v39 = vsub.f32 %v1885_v31, %v1891_v20  ;;  %v1888_v40 = vpop.xlane.xlu0 %1887 }
0x14b7   :  { %v1892_v41 = vsub.f32 %v1884_v23, %v1888_v40 }
0x14b8   :  { %v1896_v42 = vmul.f32 1.442695, %v1893_v39 }
0x14b9   :  { %v1894_v43 = vmul.f32 1.442695, %v1892_v41  ;;  %v2085_v9 = vpop.permute.xlu1 %2084 }
0x14ba   :  { %3295 = vpow2.f32 %v1896_v42  ;;  %v3242_v45 = vpop.permute.xlu0 %3241  ;;  %v2726_v42 = vld [vmem:[%s3895_s1 + $0xdc] ss:$0 sm:$0xff] }
0x14bb   :  { %v3244_v46 = vunpack.i.h.bf16 %v3242_v45  ;;  %v3243_v50 = vunpack.i.l.bf16 %v3242_v45  ;;  %3297 = vpow2.f32 %v1894_v43 }
0x14bd   :  { %v3149_v52 = vpack.c.bf16 %v3244_v46, %v3243_v50 }
0x14bf   :  { %3150 = vmatprep.subr.bf16.mxu0 %v3149_v52 }
0x14c0   :  { %3152 = vmatpush3.bf16.msra.mxu0 %v3149_v52 }
0x14c4   :  { %v3296_v53 = vpop.eup %3295 }
0x14c5   :  { %v1901_v54 = vsel %vm137_vm3, %v3296_v53, 0.0  ;;  %v3298_v56 = vpop.eup %3297 }
0x14c6   :  { %1902 = vadd.xlane.f32.xlu0 %v1901_v54  ;;  %v1898_v57 = vsel %vm137_vm3, %v3298_v56, 0.0 }
0x14ca   :  { %1899 = vadd.xlane.f32.xlu0 %v1898_v57 }
0x14e0   :  { %3246 = vrot.lane.b32.xlu0 %v3764_v29, %s3354_s18 }
0x14e4   :  { %2082 = vrot.lane.b32.xlu0 %v1773_v22, %s3352_s16 }
0x1553   :  { %v1903_v60 = vpop.xlane.xlu0 %1902 }
0x1554   :  { %3299 = vrcp.f32 %v1903_v60 }
0x1557   :  { %v1900_v61 = vpop.xlane.xlu0 %1899 }
0x1558   :  { %3301 = vrcp.f32 %v1900_v61 }
0x155b   :  { %v3247_v63 = vpop.permute.xlu0 %3246 }
0x155c   :  { %v3249_v1 = vunpack.i.h.bf16 %v3247_v63  ;;  %v3248_v21 = vunpack.i.l.bf16 %v3247_v63 }
0x155e   :  { %v3157_v48 = vpack.c.bf16 %v3249_v1, %v3248_v21  ;;  %v3300_v3 = vpop.eup %3299 }
0x155f   :  { %v1907_v5 = vmul.f32 %v3300_v3, %v3296_v53  ;;  %v2083_v6 = vpop.permute.xlu0 %2082 }
0x1560   :  { %3159 = vmatprep.subr.msk.bf16.mxu0 %vm3607_vm10, %v3157_v48 }
0x1562   :  { %v3302_v32 = vpop.eup %3301 }
0x1563   :  { %v1906_v4 = vmul.f32 %v3302_v32, %v3298_v56  ;;  %v1632_v32 = vld [vmem:[%s3895_s1 + $0x110] sm:$0xff] }
0x1565   :  { %2990 = vmatprep.mubr.msk.f32.mxu0 %vm137_vm3, %v1906_v4  ;;  %v1633_v4 = vld [vmem:[%s3895_s1 + $0x118] sm:$0xff] }
0x1566   :  { %2991 = vmatmul.mubr.msk.f32.vlgmr.msra.gmra.mrb[18].mxu0 %vm137_vm3, %v1907_v5  ;;  %v3175_v5 = vpack.c.bf16 %v1633_v4, %v1632_v32 }
0x1567   :  { %3162 = vmatpush3.bf16.xpose.msk.msra.mxu0 %vm3607_vm10, %v3157_v48  ;;  %3004 = vmatprep.mubr.msk.f32.mxu0 %vm137_vm3, %v2083_v6  ;;  %v1631_v48 = vld [vmem:[%s3895_s1 + $0x108] sm:$0xff] }
0x156e   :  { %3005 = vmatmul.mubr.msk.f32.vlgmr.msra.gmra.mrb[20].mxu0 %vm137_vm3, %v2085_v9 }
0x1639   :  { %v2992_v44 = vpop.f32.mrb[18].mxu0 }
0x163a   :  { %v1986_v11 = vpop.f32.mrb[19].mxu0 }
0x163b   :  { %2997 = vmatprep.mubr.msk.f32.mxu1 %vm137_vm3, %v1986_v11 }
0x163c   :  { %2998 = vmatmul.mubr.msk.f32.vlgmr.msra.gmra.mrb[24].mxu1 %vm137_vm3, %v2992_v44 }
0x1641   :  { %v3006_v12 = vpop.f32.mrb[20].mxu0 }
0x1642   :  { %v2174_v13 = vmul.f32 0.25, %v3006_v12  ;;  %v2164_v14 = vpop.f32.mrb[21].mxu0 }
0x1643   :  { %v2173_v15 = vmul.f32 0.25, %v2164_v14 }
0x1644   :  { %v2176_v16 = vadd.f32 %v2174_v13, %v3621_v62 }
0x1645   :  { %v2175_v51 = vadd.f32 %v2173_v15, %v3623_v2  ;;  %v2735_v15 = vld [vmem:[%s3895_s1 + $0xda] ss:$0 sm:$0xff] }
0x1646   :  { %v2180_v17 = vsel %vm137_vm3, %v2176_v16, -inf }
0x1647   :  { %2181 = vmax.xlane.f32.xlu1 %v2180_v17  ;;  %v2177_v18 = vsel %vm137_vm3, %v2175_v51, -inf }
0x1648   :  { %2178 = vmax.xlane.f32.xlu0 %v2177_v18 }
0x16d4   :  { %v2182_v19 = vpop.xlane.xlu1 %2181 }
0x16d5   :  { %v2184_v22 = vsub.f32 %v2176_v16, %v2182_v19  ;;  %v2179_v24 = vpop.xlane.xlu0 %2178 }
0x16d6   :  { %v2183_v25 = vsub.f32 %v2175_v51, %v2179_v24  ;;  %v2736_v51 = vld [vmem:[%s3895_s1 + $0xdb] ss:$0 sm:$0xff] }
0x16d7   :  { %v2187_v26 = vmul.f32 1.442695, %v2184_v22 }
0x16d8   :  { %v2185_v27 = vmul.f32 1.442695, %v2183_v25 }
0x16d9   :  { %3303 = vpow2.f32 %v2187_v26  ;;  %v1634_v26 = vld [vmem:[%s3895_s1 + $0x120] sm:$0xff] }
0x16da   :  { %3305 = vpow2.f32 %v2185_v27  ;;  %v1635_v27 = vld [vmem:[%s3895_s1 + $0x128] sm:$0xff] }
0x16e3   :  { %v3304_v30 = vpop.eup %3303 }
0x16e4   :  { %v2192_v34 = vsel %vm137_vm3, %v3304_v30, 0.0  ;;  %v3306_v62 = vpop.eup %3305 }
0x16e5   :  { %2193 = vadd.xlane.f32.xlu0 %v2192_v34  ;;  %v2189_v2 = vsel %vm137_vm3, %v3306_v62, 0.0  ;;  %v1636_v34 = vld [vmem:[%s3895_s1 + $0x130] sm:$0xff] }
0x16e9   :  { %2190 = vadd.xlane.f32.xlu0 %v2189_v2 }
0x16ff   :  { %3251 = vrot.lane.b32.xlu0 %v3764_v29, %s3355_s23 }
0x1772   :  { %v2194_v0 = vpop.xlane.xlu0 %2193 }
0x1773   :  { %3307 = vrcp.f32 %v2194_v0  ;;  %v2737_v0 = vld [vmem:[%s3895_s1 + $0xdd] ss:$0 sm:$0xff] }
0x1776   :  { %v2191_v8 = vpop.xlane.xlu0 %2190 }
0x1777   :  { %3309 = vrcp.f32 %v2191_v8 }
0x177a   :  { %v3252_v33 = vpop.permute.xlu0 %3251 }
0x177b   :  { %v3254_v28 = vunpack.i.h.bf16 %v3252_v33  ;;  %v3253_v31 = vunpack.i.l.bf16 %v3252_v33 }
0x177d   :  { %v3163_v23 = vpack.c.bf16 %v3254_v28, %v3253_v31  ;;  %v3308_v38 = vpop.eup %3307 }
0x177e   :  { %v2198_v39 = vmul.f32 %v3308_v38, %v3304_v30  ;;  %v3179_v30 = vpack.c.bf16 %v1635_v27, %v1634_v26 }
0x177f   :  { %3164 = vmatprep.subr.bf16.mxu1 %v3163_v23 }
0x1780   :  { %3166 = vmatpush3.bf16.msra.mxu1 %v3163_v23 }
0x1781   :  { %v3310_v29 = vpop.eup %3309  ;;  %3168 = vmatprep.subr.bf16.mxu1 %v3167_v37 }
0x1782   :  { %v2197_v20 = vmul.f32 %v3310_v29, %v3306_v62  ;;  %v1637_v62 = vld [vmem:[%s3895_s1 + $0x138] sm:$0xff] }
0x1783   :  { %v3183_v2 = vpack.c.bf16 %v1637_v62, %v1636_v34 }
0x1784   :  { %3011 = vmatprep.mubr.msk.f32.mxu1 %vm137_vm3, %v2197_v20 }
0x1785   :  { %3012 = vmatmul.mubr.msk.f32.vlgmr.msra.gmra.mrb[26].mxu1 %vm137_vm3, %v2198_v39 }
0x1786   :  { %3170 = vmatpush3.bf16.msra.mxu1 %v3167_v37 }
0x1787   :  { %3180 = vmatprep.subr.bf16.mxu1 %v3179_v30 }
0x1858   :  { %v3013_v40 = vpop.f32.mrb[26].mxu1 }
0x1859   :  { %v2277_v41 = vpop.f32.mrb[27].mxu1 }
0x185a   :  { %3018 = vmatprep.mubr.msk.f32.mxu1 %vm137_vm3, %v2277_v41 }
0x185b   :  { %3019 = vmatmul.mubr.msk.f32.vlgmr.msra.gmra.mrb[24].mxu1 %vm137_vm3, %v3013_v40 }
0x185c   :  { %3182 = vmatpush3.bf16.msra.mxu1 %v3179_v30 }
0x185d   :  { %3184 = vmatprep.subr.bf16.mxu1 %v3183_v2 }
0x1860   :  { %3186 = vmatpush3.bf16.msra.mxu1 %v3183_v2 }
0x192e   :  { %v3020_v43 = vpop.f32.mrb[24].mxu1 }
0x192f   :  { %v2358_v45 = vpop.f32.mrb[25].mxu1  ;;  %v3189_v46 = vadd.f32 %v3020_v43, %v2726_v42 }
0x1930   :  { %v3190_v50 = vadd.f32 %v2726_v42, %v2358_v45 }
0x1931   :  { %v2370_v54 = vadd.f32 %v3189_v46, %v3751_v10  ;;  %v1630_v10 = vld [vmem:[%s3895_s1 + $0x100] sm:$0xff] }
0x1932   :  { %v2369_v52 = vadd.f32 %v3190_v50, %v3747_v7  ;;  %v3171_v3 = vpack.c.bf16 %v1631_v48, %v1630_v10 }
0x1933   :  { %v2374_v56 = vsel %vm246_vm6, %v2370_v54, 0.0 }
0x1934   :  { %v2371_v53 = vsel %vm246_vm6, %v2369_v52, 0.0  ;;  %3172 = vmatprep.subr.bf16.mxu0 %v3171_v3 }
0x1935   :  { %2372 = vadd.xlane.f32.xlu1 %v2371_v53  ;;  %3174 = vmatpush3.bf16.msra.mxu0 %v3171_v3 }
0x1936   :  { %3176 = vmatprep.subr.bf16.mxu0 %v3175_v5 }
0x1939   :  { %2375 = vadd.xlane.f32.xlu1 %v2374_v56  ;;  %3178 = vmatpush3.bf16.msra.mxu0 %v3175_v5  ;;  %v2740_v56 = vld [vmem:[%s3895_s1 + $0xde] ss:$0 sm:$0xff] }
0x19c2   :  { %v2373_v57 = vpop.xlane.xlu1 %2372 }
0x19c3   :  { %v2377_v58 = vmul.f32 0.03125, %v2373_v57 }
0x19c5   :  { %v2379_v59 = vsub.f32 %v2369_v52, %v2377_v58 }
0x19c6   :  { %v2376_v49 = vpop.xlane.xlu1 %2375 }
0x19c7   :  { %v2378_v60 = vmul.f32 0.03125, %v2376_v49  ;;  %v2381_v61 = vmul.f32 %v2379_v59, %v2379_v59 }
0x19c9   :  { %v2380_v63 = vsub.f32 %v2370_v54, %v2378_v60  ;;  %v2383_v1 = vsel %vm246_vm6, %v2381_v61, 0.0 }
0x19ca   :  { %2384 = vadd.xlane.f32.xlu1 %v2383_v1 }
0x19cb   :  { %v2382_v21 = vmul.f32 %v2380_v63, %v2380_v63 }
0x19cd   :  { %v2386_v7 = vsel %vm246_vm6, %v2382_v21, 0.0 }
0x19ce   :  { %2387 = vadd.xlane.f32.xlu0 %v2386_v7 }
0x1a57   :  { %v2385_v6 = vpop.xlane.xlu1 %2384 }
0x1a58   :  { %v2389_v9 = vmul.f32 0.03125, %v2385_v6 }
0x1a5a   :  { %v2391_v44 = vadd.f32 1e-08, %v2389_v9 }
0x1a5b   :  { %v2388_v11 = vpop.xlane.xlu0 %2387 }
0x1a5c   :  { %3311 = vrsqrt.f32 %v2391_v44  ;;  %v2390_v12 = vmul.f32 0.03125, %v2388_v11 }
0x1a5e   :  { %v2392_v13 = vadd.f32 1e-08, %v2390_v12 }
0x1a60   :  { %3313 = vrsqrt.f32 %v2392_v13 }
0x1a66   :  { %v3312_v14 = vpop.eup %3311 }
0x1a67   :  { %v2395_v16 = vmul.f32 %v3312_v14, %v2379_v59 }
0x1a69   :  { %v2401_v17 = vmul.f32 %v2735_v15, %v2395_v16 }
0x1a6a   :  { %v3314_v18 = vpop.eup %3313 }
0x1a6b   :  { %v2396_v19 = vmul.f32 %v3314_v18, %v2380_v63  ;;  %v2407_v22 = vadd.f32 %v2736_v51, %v2401_v17  ;;  %v2744_v18 = vld [vmem:[%s3895_s1 + $0x69] ss:$0 sm:$0xff] }
0x1a6d   :  { %v2402_v24 = vmul.f32 %v2735_v15, %v2396_v19  ;;  %3029 = vmatprep.mubr.msk.f32.mxu0 %vm246_vm6, %v2407_v22 }
0x1a6f   :  { %v2408_v25 = vadd.f32 %v2736_v51, %v2402_v24  ;;  %v2743_v51 = vld [vmem:[%s3895_s1 + $0x68] ss:$0 sm:$0xff] }
0x1a71   :  { %3030 = vmatmul.mubr.msk.f32.vlgmr.msra.gmra.mrb[22].mxu0 %vm246_vm6, %v2408_v25 }
0x1b44   :  { %v3031_v8 = vpop.f32.mrb[22].mxu0 }
0x1b45   :  { %v2491_v33 = vadd.f32 %v3031_v8, %v2737_v0  ;;  %v2485_v35 = vpop.f32.mrb[23].mxu0 }
0x1b46   :  { %v2486_v36 = vadd.f32 %v2737_v0, %v2485_v35 }
0x1b47   :  { %v2495_v28 = vmul.f32 %v2491_v33, %v2491_v33 }
0x1b48   :  { %v2494_v31 = vmul.f32 %v2486_v36, %v2486_v36 }
0x1b49   :  { %v2497_v23 = vmul.f32 %v2495_v28, %v2491_v33 }
0x1b4a   :  { %v2496_v37 = vmul.f32 %v2494_v31, %v2486_v36 }
0x1b4b   :  { %v2499_v38 = vmul.f32 0.044715, %v2497_v23 }
0x1b4c   :  { %v2498_v29 = vmul.f32 0.044715, %v2496_v37 }
0x1b4d   :  { %v2501_v20 = vadd.f32 %v2499_v38, %v2491_v33 }
0x1b4e   :  { %v2500_v39 = vadd.f32 %v2498_v29, %v2486_v36 }
0x1b4f   :  { %v2503_v40 = vmul.f32 0.7978846, %v2501_v20 }
0x1b50   :  { %v2502_v41 = vmul.f32 0.7978846, %v2500_v39 }
0x1b51   :  { %3315 = vtanh.f32 %v2503_v40 }
0x1b52   :  { %3317 = vtanh.f32 %v2502_v41 }
0x1b5b   :  { %v3316_v42 = vpop.eup %3315 }
0x1b5c   :  { %v3318_v43 = vpop.eup %3317  ;;  %v2507_v45 = vadd.f32 1.0, %v3316_v42 }
0x1b5d   :  { %v2506_v46 = vadd.f32 1.0, %v3318_v43 }
0x1b5e   :  { %v2509_v50 = vmul.f32 0.5, %v2507_v45 }
0x1b5f   :  { %v2508_v52 = vmul.f32 0.5, %v2506_v46 }
0x1b60   :  { %v2511_v54 = vmul.f32 %v2509_v50, %v2491_v33 }
0x1b61   :  { %v2510_v53 = vmul.f32 %v2508_v52, %v2486_v36 }
0x1b63   :  { %3040 = vmatprep.mubr.msk.f32.mxu1 %vm246_vm6, %v2510_v53 }
0x1b64   :  { %3041 = vmatmul.mubr.msk.f32.vlgmr.msra.gmra.mrb[28].mxu1 %vm246_vm6, %v2511_v54 }
0x1c37   :  { %v3042_v57 = vpop.f32.mrb[28].mxu1 }
0x1c38   :  { %v2594_v58 = vadd.f32 %v3042_v57, %v2740_v56  ;;  %v2588_v59 = vpop.f32.mrb[29].mxu1 }
0x1c39   :  { %v2589_v49 = vadd.f32 %v2740_v56, %v2588_v59 }
0x1c3a   :  { %v2598_v60 = vadd.f32 %v2594_v58, %v2408_v25 }
0x1c3b   :  { %v2597_v61 = vadd.f32 %v2589_v49, %v2407_v22 }
0x1c3c   :  { %v2600_v21 = vmul.f32 %v3553_v55, %v2598_v60 }
0x1c3d   :  { %v2599_v63 = vmul.f32 %v3549_v47, %v2597_v61 }
0x1c3e   :  { %v2606_v7 = vsel %vm246_vm6, %v2600_v21, 0.0 }
0x1c3f   :  { %v2603_v1 = vsel %vm246_vm6, %v2599_v63, 0.0 }
0x1c40   :  { %2604 = vadd.xlane.f32.xlu1 %v2603_v1 }
0x1c44   :  { %2607 = vadd.xlane.f32.xlu1 %v2606_v7 }
0x1ccd   :  { %v2605_v10 = vpop.xlane.xlu1 %2604 }
0x1cce   :  { %v2609_v48 = vmul.f32 0.03125, %v2605_v10 }
0x1cd0   :  { %v2611_v3 = vsub.f32 %v2599_v63, %v2609_v48 }
0x1cd1   :  { %v2608_v32 = vpop.xlane.xlu1 %2607 }
0x1cd2   :  { %v2610_v4 = vmul.f32 0.03125, %v2608_v32  ;;  %v2613_v5 = vmul.f32 %v2611_v3, %v2611_v3 }
0x1cd4   :  { %v2612_v6 = vsub.f32 %v2600_v21, %v2610_v4  ;;  %v2615_v9 = vsel %vm246_vm6, %v2613_v5, 0.0 }
0x1cd5   :  { %2616 = vadd.xlane.f32.xlu1 %v2615_v9 }
0x1cd6   :  { %v2614_v44 = vmul.f32 %v2612_v6, %v2612_v6 }
0x1cd8   :  { %v2618_v47 = vsel %vm246_vm6, %v2614_v44, 0.0 }
0x1cd9   :  { %2619 = vadd.xlane.f32.xlu1 %v2618_v47 }
0x1d62   :  { %v2617_v11 = vpop.xlane.xlu1 %2616 }
0x1d63   :  { %v2621_v55 = vmul.f32 0.03125, %v2617_v11 }
0x1d65   :  { %v2623_v12 = vadd.f32 1e-08, %v2621_v55 }
0x1d66   :  { %v2620_v13 = vpop.xlane.xlu1 %2619 }
0x1d67   :  { %3319 = vrsqrt.f32 %v2623_v12  ;;  %v2622_v14 = vmul.f32 0.03125, %v2620_v13 }
0x1d69   :  { %v2624_v15 = vadd.f32 1e-08, %v2622_v14 }
0x1d6b   :  { %3321 = vrsqrt.f32 %v2624_v15 }
0x1d71   :  { %v3320_v16 = vpop.eup %3319 }
0x1d72   :  { %v2627_v17 = vmul.f32 %v3320_v16, %v2611_v3 }
0x1d74   :  { %v2633_v19 = vmul.f32 %v2743_v51, %v2627_v17 }
0x1d75   :  { %v3322_v22 = vpop.eup %3321 }
0x1d76   :  { %v2628_v24 = vmul.f32 %v3322_v22, %v2612_v6  ;;  %v2639_v25 = vadd.f32 %v2744_v18, %v2633_v19 }
0x1d78   :  { %v2634_v26 = vmul.f32 %v2743_v51, %v2628_v24  ;;  %2641 = vst.msk [vmem:[#allocation3] sm:$0xff] %vm246_vm6, %v2639_v25 }
0x1d7a   :  { %v2640_v27 = vadd.f32 %v2744_v18, %v2634_v26 }
0x1d7c   :  { %2642 = vst.msk [vmem:[#allocation3 + $0x8] sm:$0xff] %vm246_vm6, %v2640_v27 }
0x1d7d   :  { %3334 = shalt.err (!%p3331_p4)
}
0x1d7e   :  { %s3335_s2 = scalar_lea.hbm %s3898_s4, 256 }
0x1d7f   :  { %p3336_p5 = scmp.ne.s32.totalorder %s3898_s4, %s3335_s2  ;;  %p3339_p6 = scmp.lt.u32.totalorder %s3335_s2, %s3898_s4 }
0x1d81   :  { %p3341_p7 = pnand %p3339_p6, %p3336_p5 }
0x1d83   :  { %3344 = shalt.err (!%p3341_p7)
}
0x1d84   :  { %s3357_s6 = smov 128   ;;  %s3358_s7 = smov 8  }
0x1d85   :  { %2654 = dma.vmem_to_hbm [thread:$0]  %s2649_s26, 256, %s3898_s4, [#allocation4], %s3357_s6, %s3357_s6, %s3358_s7  }
0x1d86   :  { %3345 = dma.done.wait [#allocation4], 256  }
0x1d87   :  { %3346 = vsyncadd [#allocation4], 4294967040 }
0x1d88   :  { %2658 = vsyncpa [#allocation4], 1 }

</bundles_post_ra>
